<compile_context>
chip_gen: v6e
topology: v6e:2x2x1
jax: 0.10.0
libtpu: 0.0.40
codegen_flags: <defaults>
</compile_context>

<pallas_src>
import math
from functools import partial
from typing import NamedTuple

import jax
import jax.numpy as jnp
from jax import lax
from jax.experimental import pallas as pl
from jax.experimental.pallas import tpu as pltpu

# Default GEMM tiles (bf16 operands, f32 accumulation).
TM, TN, TK = 512, 512, 1024
NEG_INF = -1e30


def _round_up(x, m):
    return (x + m - 1) // m * m


class MLAConfig(NamedTuple):
    n_heads: int
    qk_nope_head_dim: int
    qk_rope_head_dim: int
    v_head_dim: int
    kv_lora_rank: int
    rms_eps: float
    softmax_scale: float
    block_t: int


# --------------------------------------------------------------------------- #
# Generic tiled GEMM (wq / wkv_a projections)
# --------------------------------------------------------------------------- #

def _matmul_kernel(x_ref, w_ref, o_ref, acc_ref):
    @pl.when(pl.program_id(2) == 0)
    def _():
        acc_ref[...] = jnp.zeros_like(acc_ref)

    acc_ref[...] += jnp.dot(x_ref[...], w_ref[...],
                            preferred_element_type=jnp.float32)

    @pl.when(pl.program_id(2) == pl.num_programs(2) - 1)
    def _():
        o_ref[...] = acc_ref[...].astype(o_ref.dtype)


def prepare_weight(w, *, tn=TN, tk=TK):
    """[N, K] torch-layout weight -> pre-transposed, pre-padded [Kp, Np].

    Done once at init so no per-call weight transposes / pads hit HBM."""
    n, k = w.shape
    wt = w.T
    kp = k if k <= tk else _round_up(k, tk)
    np_ = n if n <= tn else _round_up(n, tn)
    if (kp, np_) != (k, n):
        wt = jnp.pad(wt, ((0, kp - k), (0, np_ - n)))
    return wt


def pallas_linear(x2d, weight_t, n_out, *, tm=TM, tn=TN, tk=TK):
    """y = x2d @ weight_t, weight_t pre-padded [Kp, Np]; returns [M, n_out]."""
    m, k = x2d.shape
    kp, np_ = weight_t.shape
    bm = m if m <= tm else tm
    bn = np_ if np_ <= tn else tn
    bk = kp if kp <= tk else tk
    mp = _round_up(m, bm)
    if (mp, kp) != (m, k):
        x2d = jnp.pad(x2d, ((0, mp - m), (0, kp - k)))
    grid = (mp // bm, np_ // bn, kp // bk)
    out = pl.pallas_call(
        _matmul_kernel,
        out_shape=jax.ShapeDtypeStruct((mp, np_), x2d.dtype),
        grid=grid,
        in_specs=[
            pl.BlockSpec((bm, bk), lambda i, j, kk: (i, kk)),
            pl.BlockSpec((bk, bn), lambda i, j, kk: (kk, j)),
        ],
        out_specs=pl.BlockSpec((bm, bn), lambda i, j, kk: (i, j)),
        scratch_shapes=[pltpu.VMEM((bm, bn), jnp.float32)],
        compiler_params=pltpu.CompilerParams(
            dimension_semantics=("parallel", "parallel", "arbitrary")),
        cost_estimate=pl.CostEstimate(
            flops=2 * m * np_ * kp, transcendentals=0,
            bytes_accessed=(mp * kp + kp * np_ + mp * np_) * x2d.dtype.itemsize),
    )(x2d, weight_t)
    return out[:m, :n_out]


# --------------------------------------------------------------------------- #
# RMSNorm kernel (kv_norm)
# --------------------------------------------------------------------------- #

def _rmsnorm_kernel(x_ref, w_ref, o_ref, *, eps):
    x = x_ref[...].astype(jnp.float32)
    rms = jnp.sqrt(jnp.mean(x * x, axis=-1, keepdims=True) + eps)
    o_ref[...] = (x / rms * w_ref[...].astype(jnp.float32)).astype(o_ref.dtype)


def pallas_rmsnorm(x2d, weight, eps=1e-6, *, tm=256):
    m, d = x2d.shape
    bm = m if m <= tm else tm
    mp = _round_up(m, bm)
    if mp != m:
        x2d = jnp.pad(x2d, ((0, mp - m), (0, 0)))
    out = pl.pallas_call(
        partial(_rmsnorm_kernel, eps=eps),
        out_shape=jax.ShapeDtypeStruct((mp, d), x2d.dtype),
        grid=(mp // bm,),
        in_specs=[pl.BlockSpec((bm, d), lambda i: (i, 0)),
                  pl.BlockSpec((1, d), lambda i: (0, 0))],
        out_specs=pl.BlockSpec((bm, d), lambda i: (i, 0)),
        compiler_params=pltpu.CompilerParams(dimension_semantics=("parallel",)),
    )(x2d, weight.reshape(1, d))
    return out[:m]


# --------------------------------------------------------------------------- #
# Fused absorbed-MLA attention kernel, t-tiled with online softmax
# grid = (heads, batch, t_tiles)  ->  wkv_b blocks fetched once per head
# --------------------------------------------------------------------------- #

def _mla_attn_kernel(q_ref, kv_ref, wn_ref, wv_ref, o_ref,
                     qcat_ref, m_ref, l_ref, acc_ref, *,
                     scale, start_pos, end_pos, block_t, d_nope, c_kv):
    ti = pl.program_id(2)

    @pl.when(ti == 0)
    def _():
        # Absorb q_nope through wkv_b's nope block once per (head, batch);
        # pack [q_abs | q_pe] so each t-tile needs a single fused score dot.
        q = q_ref[0, 0]                                   # (s, d_nope + r) bf16
        wn = wn_ref[0]                                    # (d_nope, c)     bf16
        q_abs = jnp.dot(q[:, :d_nope], wn,
                        preferred_element_type=jnp.float32)
        qcat_ref[...] = jnp.concatenate(
            [q_abs.astype(qcat_ref.dtype), q[:, d_nope:]], axis=-1)
        m_ref[...] = jnp.full_like(m_ref, -jnp.inf)
        l_ref[...] = jnp.zeros_like(l_ref)
        acc_ref[...] = jnp.zeros_like(acc_ref)

    kv = kv_ref[0]                                        # (bt, c + r) bf16
    qcat = qcat_ref[...]                                  # (s,  c + r) bf16

    # Fused latent + rope scores (one MXU pass), f32 accumulation.
    s_blk = lax.dot_general(qcat, kv, (((1,), (1,)), ((), ())),
                            preferred_element_type=jnp.float32) * scale

    # In-kernel causal / validity mask (no HBM mask tensor).
    q_pos = start_pos + lax.broadcasted_iota(jnp.int32, s_blk.shape, 0)
    k_pos = ti * block_t + lax.broadcasted_iota(jnp.int32, s_blk.shape, 1)
    s_blk = jnp.where((k_pos <= q_pos) & (k_pos < end_pos), s_blk, NEG_INF)

    # Online softmax update.
    m_prev = m_ref[...]
    m_new = jnp.maximum(m_prev, jnp.max(s_blk, axis=-1, keepdims=True))
    alpha = jnp.exp(m_prev - m_new)
    p = jnp.exp(s_blk - m_new)
    l_ref[...] = alpha * l_ref[...] + jnp.sum(p, axis=-1, keepdims=True)
    acc_ref[...] = alpha * acc_ref[...] + jnp.dot(
        p.astype(kv.dtype), kv[:, :c_kv], preferred_element_type=jnp.float32)
    m_ref[...] = m_new

    @pl.when(ti == pl.num_programs(2) - 1)
    def _():
        # Normalize and fuse the value up-projection (wkv_b value block).
        o_lat = acc_ref[...] * pl.reciprocal(l_ref[...], approx=True)
        wv = wv_ref[0]                                    # (c, dv) bf16
        o_ref[0, 0] = jnp.dot(o_lat.astype(wv.dtype), wv,
                              preferred_element_type=jnp.float32
                              ).astype(o_ref.dtype)


def pallas_mla_attention(q, kvpe_cache, w_nope, w_v_t, *, scale, start_pos,
                         end_pos, block_t):
    """q [b,h,s,d_nope+r], kvpe_cache [b,T,c+r], w_nope [h,d_nope,c],
    w_v_t [h,c,dv] -> out [b,h,s,dv]."""
    b, h, s, qkd = q.shape
    e = kvpe_cache.shape[-1]
    d_nope, c = w_nope.shape[1], w_nope.shape[2]
    dv = w_v_t.shape[2]
    r = qkd - d_nope
    nt = pl.cdiv(end_pos, block_t)

    return pl.pallas_call(
        partial(_mla_attn_kernel, scale=scale, start_pos=start_pos,
                end_pos=end_pos, block_t=block_t, d_nope=d_nope, c_kv=c),
        out_shape=jax.ShapeDtypeStruct((b, h, s, dv), q.dtype),
        grid=(h, b, nt),
        in_specs=[
            pl.BlockSpec((1, 1, s, qkd), lambda hi, bi, ti: (bi, hi, 0, 0)),
            pl.BlockSpec((1, block_t, e), lambda hi, bi, ti: (bi, ti, 0)),
            pl.BlockSpec((1, d_nope, c), lambda hi, bi, ti: (hi, 0, 0)),
            pl.BlockSpec((1, c, dv), lambda hi, bi, ti: (hi, 0, 0)),
        ],
        out_specs=pl.BlockSpec((1, 1, s, dv), lambda hi, bi, ti: (bi, hi, 0, 0)),
        scratch_shapes=[
            pltpu.VMEM((s, c + r), q.dtype),          # packed [q_abs | q_pe]
            pltpu.VMEM((s, 1), jnp.float32),          # running max
            pltpu.VMEM((s, 1), jnp.float32),          # running denom
            pltpu.VMEM((s, c), jnp.float32),          # latent accumulator
        ],
        compiler_params=pltpu.CompilerParams(
            dimension_semantics=("parallel", "parallel", "arbitrary")),
    )(q, kvpe_cache, w_nope, w_v_t)


# --------------------------------------------------------------------------- #
# Output projection: reduce over heads directly from [b, h, s, dv] (no transpose)
# --------------------------------------------------------------------------- #

def _wo_kernel(x_ref, w_ref, o_ref, acc_ref):
    @pl.when(pl.program_id(2) == 0)
    def _():
        acc_ref[...] = jnp.zeros_like(acc_ref)

    acc_ref[...] += jnp.dot(x_ref[0, 0], w_ref[0],
                            preferred_element_type=jnp.float32)

    @pl.when(pl.program_id(2) == pl.num_programs(2) - 1)
    def _():
        o_ref[0] = acc_ref[...].astype(o_ref.dtype)


def pallas_wo(o_heads, wo_h, n_out, *, tn=TN):
    """o_heads [b,h,s,dv], wo_h [h,dv,dim] -> out [b,s,dim]."""
    b, h, s, dv = o_heads.shape
    n = wo_h.shape[2]
    bn = n if n <= tn else tn
    assert n % bn == 0
    out = pl.pallas_call(
        _wo_kernel,
        out_shape=jax.ShapeDtypeStruct((b, s, n), o_heads.dtype),
        grid=(b, n // bn, h),
        in_specs=[
            pl.BlockSpec((1, 1, s, dv), lambda bi, j, hi: (bi, hi, 0, 0)),
            pl.BlockSpec((1, dv, bn), lambda bi, j, hi: (hi, 0, j)),
        ],
        out_specs=pl.BlockSpec((1, s, bn), lambda bi, j, hi: (bi, 0, j)),
        scratch_shapes=[pltpu.VMEM((s, bn), jnp.float32)],
        compiler_params=pltpu.CompilerParams(
            dimension_semantics=("parallel", "parallel", "arbitrary")),
    )(o_heads, wo_h)
    return out[:, :, :n_out]


# --------------------------------------------------------------------------- #
# Rotary embedding (jnp glue, matches torch view_as_complex pairing)
# --------------------------------------------------------------------------- #

def apply_rotary_emb(x, cos, sin):
    """x [..., s, h, r] with interleaved (real, imag) pairs; cos/sin [s, r/2]."""
    xr = x[..., 0::2].astype(jnp.float32)
    xi = x[..., 1::2].astype(jnp.float32)
    cos_b = cos[None, :, None, :]
    sin_b = sin[None, :, None, :]
    yr = xr * cos_b - xi * sin_b
    yi = xr * sin_b + xi * cos_b
    y = jnp.stack([yr, yi], axis=-1).reshape(x.shape)
    return y.astype(x.dtype)


# --------------------------------------------------------------------------- #
# MLA forward (absorb path, q_lora_rank == 0)
# --------------------------------------------------------------------------- #

def mla_forward(params, kvpe_cache, x, cos, sin, start_pos, cfg):
    bsz, seqlen, dim = x.shape
    end_pos = start_pos + seqlen
    h, d_nope, d_rope = cfg.n_heads, cfg.qk_nope_head_dim, cfg.qk_rope_head_dim
    d_v, c_kv = cfg.v_head_dim, cfg.kv_lora_rank
    qkd = d_nope + d_rope
    x2d = x.reshape(bsz * seqlen, dim)

    # q projection + rotary on rope part.
    q = pallas_linear(x2d, params["wq_t"], h * qkd).reshape(bsz, seqlen, h, qkd)
    q_pe = apply_rotary_emb(q[..., d_nope:], cos, sin)
    q = jnp.concatenate([q[..., :d_nope], q_pe], axis=-1)
    # TODO(synk): fuse this head-major relayout into the wq GEMM out_spec.
    q = jnp.transpose(q, (0, 2, 1, 3))                     # [b, h, s, qkd] bf16

    # kv latent projection, rope and norm.
    kv = pallas_linear(x2d, params["wkv_a_t"], c_kv + d_rope)
    kv = kv.reshape(bsz, seqlen, c_kv + d_rope)
    k_pe = apply_rotary_emb(kv[:, :, c_kv:][:, :, None, :], cos, sin)[:, :, 0, :]
    kv_n = pallas_rmsnorm(kv[:, :, :c_kv].reshape(bsz * seqlen, c_kv),
                          params["kv_norm_w"], cfg.rms_eps)
    kv_n = kv_n.reshape(bsz, seqlen, c_kv)

    # Fused [kv | pe] cache update; the cache buffer is donated by the caller
    # (jax.jit donate_argnames) so this is an in-place HBM update.
    new_vals = jnp.concatenate([kv_n, k_pe], axis=-1).astype(kvpe_cache.dtype)
    kvpe_cache = lax.dynamic_update_slice(kvpe_cache, new_vals, (0, start_pos, 0))

    # Fused absorbed attention over keys [0, end_pos), t-tiled, in-kernel mask.
    o = pallas_mla_attention(q, kvpe_cache, params["wkv_b_nope"],
                             params["wkv_b_v_t"], scale=cfg.softmax_scale,
                             start_pos=start_pos, end_pos=end_pos,
                             block_t=cfg.block_t)          # [b, h, s, dv]

    out = pallas_wo(o, params["wo_h"], dim)                # [b, s, dim]
    return out, kvpe_cache


def xavier_normal(key, out_f, in_f, dtype=jnp.float32):
    std = math.sqrt(2.0 / (in_f + out_f))
    return std * jax.random.normal(key, (out_f, in_f), dtype=dtype)


# --------------------------------------------------------------------------- #
# main
# --------------------------------------------------------------------------- #

if __name__ == "__main__":
    # Small MLA config (structure follows ModelArgs; sizes scaled down).
    dim, n_heads = 64, 4
    d_nope, d_rope, d_v, c_kv = 32, 16, 32, 32
    qk_head_dim = d_nope + d_rope
    bsz, seqlen, start_pos = 2, 16, 0
    max_seq_len = 32
    block_t = 8                        # exercises 2 t-tiles of online softmax
    rope_theta = 10000.0
    rms_eps = 1e-6
    softmax_scale = qk_head_dim ** (-0.5)   # max_seq_len <= original_seq_len
    dt = jnp.bfloat16

    cfg = MLAConfig(n_heads=n_heads, qk_nope_head_dim=d_nope,
                    qk_rope_head_dim=d_rope, v_head_dim=d_v, kv_lora_rank=c_kv,
                    rms_eps=rms_eps, softmax_scale=softmax_scale,
                    block_t=block_t)

    key = jax.random.PRNGKey(0)
    kx, kwq, kwkva, kwkvb, kwo = jax.random.split(key, 5)

    x_f32 = jax.random.normal(kx, (bsz, seqlen, dim), jnp.float32)
    x = x_f32.astype(dt)

    wq = xavier_normal(kwq, n_heads * qk_head_dim, dim).astype(dt)       # [N,K]
    wkv_a = xavier_normal(kwkva, c_kv + d_rope, dim).astype(dt)
    wkv_b = xavier_normal(kwkvb, n_heads * (d_nope + d_v), c_kv).astype(dt)
    wo = xavier_normal(kwo, dim, n_heads * d_v).astype(dt)
    kv_norm_w = jnp.ones((c_kv,), jnp.float32)

    wkv_b_r = wkv_b.reshape(n_heads, d_nope + d_v, c_kv)
    params = dict(
        wq_t=prepare_weight(wq),                       # [K,N] pre-padded, bf16
        wkv_a_t=prepare_weight(wkv_a),
        wkv_b_nope=wkv_b_r[:, :d_nope, :],             # [h, d_nope, c]
        wkv_b_v_t=jnp.transpose(wkv_b_r[:, d_nope:, :], (0, 2, 1)),  # [h, c, dv]
        wo_h=wo.T.reshape(n_heads, d_v, dim),          # [h, dv, dim]
        kv_norm_w=kv_norm_w,
    )
    kvpe_cache = jnp.zeros((bsz, max_seq_len, c_kv + d_rope), dt)

    # freqs_cis for positions [start_pos, end_pos)
    inv_freq = 1.0 / (rope_theta ** (jnp.arange(0, d_rope, 2,
                                                dtype=jnp.float32) / d_rope))
    pos = jnp.arange(start_pos, start_pos + seqlen, dtype=jnp.float32)
    ang = jnp.outer(pos, inv_freq)
    cos, sin = jnp.cos(ang), jnp.sin(ang)

    fwd = jax.jit(mla_forward, static_argnames=("start_pos", "cfg"),
                  donate_argnames=("kvpe_cache",))
    out, kvpe_cache = fwd(params, kvpe_cache, x, cos, sin,
                          start_pos=start_pos, cfg=cfg)
    jax.block_until_ready(out)

    # ---------------- pure-JAX f32 reference (absorb path) ---------------- #
    f32 = jnp.float32
    xw = x.astype(f32)
    q_r = jnp.einsum('bsk,nk->bsn', xw, wq.astype(f32)).reshape(
        bsz, seqlen, n_heads, qk_head_dim)
    qn_r, qp_r = q_r[..., :d_nope], q_r[..., d_nope:]
    qp_r = apply_rotary_emb(qp_r, cos, sin)
    kv_r = jnp.einsum('bsk,nk->bsn', xw, wkv_a.astype(f32))
    kvl_r, kpe_r = kv_r[..., :c_kv], kv_r[..., c_kv:]
    kpe_r = apply_rotary_emb(kpe_r[:, :, None, :], cos, sin)[:, :, 0, :]
    rms = jnp.sqrt(jnp.mean(kvl_r ** 2, axis=-1, keepdims=True) + rms_eps)
    kvn_r = kvl_r / rms * kv_norm_w
    wkv_b_f = wkv_b.astype(f32).reshape(n_heads, d_nope + d_v, c_kv)
    q_abs_r = jnp.einsum('bshd,hdc->bshc', qn_r, wkv_b_f[:, :d_nope])
    scores_r = (jnp.einsum('bshc,btc->bsht', q_abs_r, kvn_r) +
                jnp.einsum('bshr,btr->bsht', qp_r, kpe_r)) * softmax_scale
    mask = jnp.triu(jnp.full((seqlen, seqlen), -jnp.inf, f32), k=1)
    scores_r = scores_r + mask[:, None, :]
    p_r = jax.nn.softmax(scores_r, axis=-1)
    o_r = jnp.einsum('bsht,btc->bshc', p_r, kvn_r)
    o_r = jnp.einsum('bshc,hdc->bshd', o_r, wkv_b_f[:, -d_v:])
    out_ref = jnp.einsum('bsk,nk->bsn',
                         o_r.reshape(bsz, seqlen, n_heads * d_v), wo.astype(f32))

    out_f = out.astype(f32)
    assert out.shape == (bsz, seqlen, dim)
    max_diff = float(jnp.max(jnp.abs(out_f - out_ref)))
    assert bool(jnp.allclose(out_f, out_ref, atol=5e-2, rtol=5e-2)), max_diff

    print("KERNEL_OK")
</pallas_src>

<mosaic_0001>
module attributes {stable_mosaic.version = 11 : i64} {
  func.func @_rmsnorm_kernel(%arg0: i32, %arg1: memref<32x32xbf16, #tpu.memory_space<vmem>>, %arg2: memref<1x32xf32, #tpu.memory_space<vmem>>, %arg3: memref<32x32xbf16, #tpu.memory_space<vmem>>) attributes {dimension_semantics = [#tpu.dimension_semantics<parallel>], iteration_bounds = array<i64: 1>, scalar_prefetch = 0 : i64, scratch_operands = 0 : i64, tpu.core_type = #tpu.core_type<tc>, window_params = [{transform_indices = @transform_0, window_bounds = array<i64: 32, 32>}, {pipeline_mode = #tpu.pipeline_mode<synchronous>, transform_indices = @transform_1, window_bounds = array<i64: 1, 32>}, {transform_indices = @transform_2, window_bounds = array<i64: 32, 32>}]} {
    %c0 = arith.constant 0 : index
    %c0_0 = arith.constant 0 : index
    %0 = vector.load %arg1[%c0, %c0_0] : memref<32x32xbf16, #tpu.memory_space<vmem>>, vector<32x32xbf16>
    %1 = arith.extf %0 : vector<32x32xbf16> to vector<32x32xf32>
    %2 = arith.mulf %1, %1 : vector<32x32xf32>
    %cst = arith.constant dense<0.000000e+00> : vector<32xf32>
    %3 = vector.multi_reduction <add>, %2, %cst [1] : vector<32x32xf32> to vector<32xf32>
    %4 = vector.shape_cast %3 : vector<32xf32> to vector<32x1xf32>
    %cst_1 = arith.constant 3.200000e+01 : f32
    %5 = vector.broadcast %cst_1 : f32 to vector<32x1xf32>
    %6 = arith.divf %4, %5 : vector<32x1xf32>
    %cst_2 = arith.constant 9.99999997E-7 : f32
    %7 = vector.broadcast %cst_2 : f32 to vector<32x1xf32>
    %8 = arith.addf %6, %7 : vector<32x1xf32>
    %9 = math.sqrt %8 : vector<32x1xf32>
    %10 = vector.broadcast %9 : vector<32x1xf32> to vector<32x32xf32>
    %11 = arith.divf %1, %10 : vector<32x32xf32>
    %c0_3 = arith.constant 0 : index
    %c0_4 = arith.constant 0 : index
    %12 = vector.load %arg2[%c0_3, %c0_4] : memref<1x32xf32, #tpu.memory_space<vmem>>, vector<1x32xf32>
    %13 = vector.broadcast %12 : vector<1x32xf32> to vector<32x32xf32>
    %14 = arith.mulf %11, %13 : vector<32x32xf32>
    %15 = arith.truncf %14 : vector<32x32xf32> to vector<32x32xbf16>
    %c0_5 = arith.constant 0 : index
    %c0_6 = arith.constant 0 : index
    %16 = vector.load %arg3[%c0_5, %c0_6] : memref<32x32xbf16, #tpu.memory_space<vmem>>, vector<32x32xbf16>
    tpu.vector_store %arg3[%c0_5, %c0_6], %15 {strides = array<i32>} : memref<32x32xbf16, #tpu.memory_space<vmem>>, vector<32x32xbf16>,
    return
  }
  func.func @transform_0(%arg0: i32) -> (i32, i32) {
    %c0_i32 = arith.constant 0 : i32
    %c0_i32_0 = arith.constant 0 : i32
    return %arg0, %c0_i32 : i32, i32
  }
  func.func @transform_1(%arg0: i32) -> (i32, i32) {
    %c0_i32 = arith.constant 0 : i32
    %c0_i32_0 = arith.constant 0 : i32
    %c0_i32_1 = arith.constant 0 : i32
    return %c0_i32, %c0_i32_0 : i32, i32
  }
  func.func @transform_2(%arg0: i32) -> (i32, i32) {
    %c0_i32 = arith.constant 0 : i32
    %c0_i32_0 = arith.constant 0 : i32
    return %arg0, %c0_i32 : i32, i32
  }
}

module attributes {stable_mosaic.version = 11 : i64} {
  func.func @_matmul_kernel(%arg0: i32, %arg1: i32, %arg2: i32, %arg3: memref<32x64xbf16, #tpu.memory_space<vmem>>, %arg4: memref<64x48xbf16, #tpu.memory_space<vmem>>, %arg5: memref<32x48xbf16, #tpu.memory_space<vmem>>, %arg6: memref<32x48xf32, #tpu.memory_space<vmem>>) attributes {dimension_semantics = [#tpu.dimension_semantics<parallel>, #tpu.dimension_semantics<parallel>, #tpu.dimension_semantics<arbitrary>], iteration_bounds = array<i64: 1, 1, 1>, scalar_prefetch = 0 : i64, scratch_operands = 1 : i64, tpu.core_type = #tpu.core_type<tc>, window_params = [{transform_indices = @transform_0, window_bounds = array<i64: 32, 64>}, {transform_indices = @transform_1, window_bounds = array<i64: 64, 48>}, {transform_indices = @transform_2, window_bounds = array<i64: 32, 48>}]} {
    %c0_i32 = arith.constant 0 : i32
    %0 = arith.cmpi eq, %arg2, %c0_i32 : i32
    %1 = arith.extui %0 : i1 to i32
    %c0_i32_0 = arith.constant 0 : i32
    %2 = arith.cmpi ne, %1, %c0_i32_0 : i32
    scf.if %2 {
      %cst_10 = arith.constant 0.000000e+00 : f32
      %12 = vector.broadcast %cst_10 : f32 to vector<32x48xf32>
      %c0_11 = arith.constant 0 : index
      %c0_12 = arith.constant 0 : index
      %13 = vector.load %arg6[%c0_11, %c0_12] : memref<32x48xf32, #tpu.memory_space<vmem>>, vector<32x48xf32>
      tpu.vector_store %arg6[%c0_11, %c0_12], %12 {strides = array<i32>} : memref<32x48xf32, #tpu.memory_space<vmem>>, vector<32x48xf32>,
    } else {
    }
    %c0 = arith.constant 0 : index
    %c0_1 = arith.constant 0 : index
    %3 = vector.load %arg6[%c0, %c0_1] : memref<32x48xf32, #tpu.memory_space<vmem>>, vector<32x48xf32>
    %c0_2 = arith.constant 0 : index
    %c0_3 = arith.constant 0 : index
    %4 = vector.load %arg3[%c0_2, %c0_3] : memref<32x64xbf16, #tpu.memory_space<vmem>>, vector<32x64xbf16>
    %c0_4 = arith.constant 0 : index
    %c0_5 = arith.constant 0 : index
    %5 = vector.load %arg4[%c0_4, %c0_5] : memref<64x48xbf16, #tpu.memory_space<vmem>>, vector<64x48xbf16>
    %cst = arith.constant dense<0.000000e+00> : vector<32x48xf32>
    %6 = tpu.matmul %4, %5, %cst {dimension_numbers = #tpu.dot_dimension_numbers<[1], [0], [0], [1], [0, 0, 1, 1], [], []>} : vector<32x64xbf16>, vector<64x48xbf16>, vector<32x48xf32> -> vector<32x48xf32>
    %7 = arith.addf %3, %6 : vector<32x48xf32>
    %c0_6 = arith.constant 0 : index
    %c0_7 = arith.constant 0 : index
    %8 = vector.load %arg6[%c0_6, %c0_7] : memref<32x48xf32, #tpu.memory_space<vmem>>, vector<32x48xf32>
    tpu.vector_store %arg6[%c0_6, %c0_7], %7 {strides = array<i32>} : memref<32x48xf32, #tpu.memory_space<vmem>>, vector<32x48xf32>,
    %c0_i32_8 = arith.constant 0 : i32
    %9 = arith.cmpi eq, %arg2, %c0_i32_8 : i32
    %10 = arith.extui %9 : i1 to i32
    %c0_i32_9 = arith.constant 0 : i32
    %11 = arith.cmpi ne, %10, %c0_i32_9 : i32
    scf.if %11 {
      %c0_10 = arith.constant 0 : index
      %c0_11 = arith.constant 0 : index
      %12 = vector.load %arg6[%c0_10, %c0_11] : memref<32x48xf32, #tpu.memory_space<vmem>>, vector<32x48xf32>
      %13 = arith.truncf %12 : vector<32x48xf32> to vector<32x48xbf16>
      %c0_12 = arith.constant 0 : index
      %c0_13 = arith.constant 0 : index
      %14 = vector.load %arg5[%c0_12, %c0_13] : memref<32x48xbf16, #tpu.memory_space<vmem>>, vector<32x48xbf16>
      tpu.vector_store %arg5[%c0_12, %c0_13], %13 {strides = array<i32>} : memref<32x48xbf16, #tpu.memory_space<vmem>>, vector<32x48xbf16>,
    } else {
    }
    return
  }
  func.func @transform_0(%arg0: i32, %arg1: i32, %arg2: i32) -> (i32, i32) {
    %c0_i32 = arith.constant 0 : i32
    return %arg0, %arg2 : i32, i32
  }
  func.func @transform_1(%arg0: i32, %arg1: i32, %arg2: i32) -> (i32, i32) {
    %c0_i32 = arith.constant 0 : i32
    return %arg2, %arg1 : i32, i32
  }
  func.func @transform_2(%arg0: i32, %arg1: i32, %arg2: i32) -> (i32, i32) {
    %c0_i32 = arith.constant 0 : i32
    return %arg0, %arg1 : i32, i32
  }
}

module attributes {stable_mosaic.version = 11 : i64} {
  func.func @_matmul_kernel(%arg0: i32, %arg1: i32, %arg2: i32, %arg3: memref<32x64xbf16, #tpu.memory_space<vmem>>, %arg4: memref<64x192xbf16, #tpu.memory_space<vmem>>, %arg5: memref<32x192xbf16, #tpu.memory_space<vmem>>, %arg6: memref<32x192xf32, #tpu.memory_space<vmem>>) attributes {dimension_semantics = [#tpu.dimension_semantics<parallel>, #tpu.dimension_semantics<parallel>, #tpu.dimension_semantics<arbitrary>], iteration_bounds = array<i64: 1, 1, 1>, scalar_prefetch = 0 : i64, scratch_operands = 1 : i64, tpu.core_type = #tpu.core_type<tc>, window_params = [{transform_indices = @transform_0, window_bounds = array<i64: 32, 64>}, {transform_indices = @transform_1, window_bounds = array<i64: 64, 192>}, {transform_indices = @transform_2, window_bounds = array<i64: 32, 192>}]} {
    %c0_i32 = arith.constant 0 : i32
    %0 = arith.cmpi eq, %arg2, %c0_i32 : i32
    %1 = arith.extui %0 : i1 to i32
    %c0_i32_0 = arith.constant 0 : i32
    %2 = arith.cmpi ne, %1, %c0_i32_0 : i32
    scf.if %2 {
      %cst_10 = arith.constant 0.000000e+00 : f32
      %12 = vector.broadcast %cst_10 : f32 to vector<32x192xf32>
      %c0_11 = arith.constant 0 : index
      %c0_12 = arith.constant 0 : index
      %13 = vector.load %arg6[%c0_11, %c0_12] : memref<32x192xf32, #tpu.memory_space<vmem>>, vector<32x192xf32>
      tpu.vector_store %arg6[%c0_11, %c0_12], %12 {strides = array<i32>} : memref<32x192xf32, #tpu.memory_space<vmem>>, vector<32x192xf32>,
    } else {
    }
    %c0 = arith.constant 0 : index
    %c0_1 = arith.constant 0 : index
    %3 = vector.load %arg6[%c0, %c0_1] : memref<32x192xf32, #tpu.memory_space<vmem>>, vector<32x192xf32>
    %c0_2 = arith.constant 0 : index
    %c0_3 = arith.constant 0 : index
    %4 = vector.load %arg3[%c0_2, %c0_3] : memref<32x64xbf16, #tpu.memory_space<vmem>>, vector<32x64xbf16>
    %c0_4 = arith.constant 0 : index
    %c0_5 = arith.constant 0 : index
    %5 = vector.load %arg4[%c0_4, %c0_5] : memref<64x192xbf16, #tpu.memory_space<vmem>>, vector<64x192xbf16>
    %cst = arith.constant dense<0.000000e+00> : vector<32x192xf32>
    %6 = tpu.matmul %4, %5, %cst {dimension_numbers = #tpu.dot_dimension_numbers<[1], [0], [0], [1], [0, 0, 1, 1], [], []>} : vector<32x64xbf16>, vector<64x192xbf16>, vector<32x192xf32> -> vector<32x192xf32>
    %7 = arith.addf %3, %6 : vector<32x192xf32>
    %c0_6 = arith.constant 0 : index
    %c0_7 = arith.constant 0 : index
    %8 = vector.load %arg6[%c0_6, %c0_7] : memref<32x192xf32, #tpu.memory_space<vmem>>, vector<32x192xf32>
    tpu.vector_store %arg6[%c0_6, %c0_7], %7 {strides = array<i32>} : memref<32x192xf32, #tpu.memory_space<vmem>>, vector<32x192xf32>,
    %c0_i32_8 = arith.constant 0 : i32
    %9 = arith.cmpi eq, %arg2, %c0_i32_8 : i32
    %10 = arith.extui %9 : i1 to i32
    %c0_i32_9 = arith.constant 0 : i32
    %11 = arith.cmpi ne, %10, %c0_i32_9 : i32
    scf.if %11 {
      %c0_10 = arith.constant 0 : index
      %c0_11 = arith.constant 0 : index
      %12 = vector.load %arg6[%c0_10, %c0_11] : memref<32x192xf32, #tpu.memory_space<vmem>>, vector<32x192xf32>
      %13 = arith.truncf %12 : vector<32x192xf32> to vector<32x192xbf16>
      %c0_12 = arith.constant 0 : index
      %c0_13 = arith.constant 0 : index
      %14 = vector.load %arg5[%c0_12, %c0_13] : memref<32x192xbf16, #tpu.memory_space<vmem>>, vector<32x192xbf16>
      tpu.vector_store %arg5[%c0_12, %c0_13], %13 {strides = array<i32>} : memref<32x192xbf16, #tpu.memory_space<vmem>>, vector<32x192xbf16>,
    } else {
    }
    return
  }
  func.func @transform_0(%arg0: i32, %arg1: i32, %arg2: i32) -> (i32, i32) {
    %c0_i32 = arith.constant 0 : i32
    return %arg0, %arg2 : i32, i32
  }
  func.func @transform_1(%arg0: i32, %arg1: i32, %arg2: i32) -> (i32, i32) {
    %c0_i32 = arith.constant 0 : i32
    return %arg2, %arg1 : i32, i32
  }
  func.func @transform_2(%arg0: i32, %arg1: i32, %arg2: i32) -> (i32, i32) {
    %c0_i32 = arith.constant 0 : i32
    return %arg0, %arg1 : i32, i32
  }
}

module attributes {stable_mosaic.version = 11 : i64} {
  func.func @_wo_kernel(%arg0: i32, %arg1: i32, %arg2: i32, %arg3: memref<1x1x16x32xbf16, #tpu.memory_space<vmem>>, %arg4: memref<1x32x64xbf16, #tpu.memory_space<vmem>>, %arg5: memref<1x16x64xbf16, #tpu.memory_space<vmem>>, %arg6: memref<16x64xf32, #tpu.memory_space<vmem>>) attributes {dimension_semantics = [#tpu.dimension_semantics<parallel>, #tpu.dimension_semantics<parallel>, #tpu.dimension_semantics<arbitrary>], iteration_bounds = array<i64: 2, 1, 4>, scalar_prefetch = 0 : i64, scratch_operands = 1 : i64, tpu.core_type = #tpu.core_type<tc>, window_params = [{transform_indices = @transform_0, window_bounds = array<i64: 1, 1, 16, 32>}, {transform_indices = @transform_1, window_bounds = array<i64: 1, 32, 64>}, {transform_indices = @transform_2, window_bounds = array<i64: 1, 16, 64>}]} {
    %c0_i32 = arith.constant 0 : i32
    %0 = arith.cmpi eq, %arg2, %c0_i32 : i32
    %1 = arith.extui %0 : i1 to i32
    %c0_i32_0 = arith.constant 0 : i32
    %2 = arith.cmpi ne, %1, %c0_i32_0 : i32
    scf.if %2 {
      %cst_12 = arith.constant 0.000000e+00 : f32
      %14 = vector.broadcast %cst_12 : f32 to vector<16x64xf32>
      %c0_13 = arith.constant 0 : index
      %c0_14 = arith.constant 0 : index
      %15 = vector.load %arg6[%c0_13, %c0_14] : memref<16x64xf32, #tpu.memory_space<vmem>>, vector<16x64xf32>
      tpu.vector_store %arg6[%c0_13, %c0_14], %14 {strides = array<i32>} : memref<16x64xf32, #tpu.memory_space<vmem>>, vector<16x64xf32>,
    } else {
    }
    %c0 = arith.constant 0 : index
    %c0_1 = arith.constant 0 : index
    %3 = vector.load %arg6[%c0, %c0_1] : memref<16x64xf32, #tpu.memory_space<vmem>>, vector<16x64xf32>
    %c0_2 = arith.constant 0 : index
    %c0_3 = arith.constant 0 : index
    %c0_4 = arith.constant 0 : index
    %c0_5 = arith.constant 0 : index
    %4 = vector.load %arg3[%c0_2, %c0_3, %c0_4, %c0_5] : memref<1x1x16x32xbf16, #tpu.memory_space<vmem>>, vector<1x1x16x32xbf16>
    %5 = vector.shape_cast %4 : vector<1x1x16x32xbf16> to vector<16x32xbf16>
    %c0_6 = arith.constant 0 : index
    %c0_7 = arith.constant 0 : index
    %c0_8 = arith.constant 0 : index
    %6 = vector.load %arg4[%c0_6, %c0_7, %c0_8] : memref<1x32x64xbf16, #tpu.memory_space<vmem>>, vector<1x32x64xbf16>
    %7 = vector.shape_cast %6 : vector<1x32x64xbf16> to vector<32x64xbf16>
    %cst = arith.constant dense<0.000000e+00> : vector<16x64xf32>
    %8 = tpu.matmul %5, %7, %cst {dimension_numbers = #tpu.dot_dimension_numbers<[1], [0], [0], [1], [0, 0, 1, 1], [], []>} : vector<16x32xbf16>, vector<32x64xbf16>, vector<16x64xf32> -> vector<16x64xf32>
    %9 = arith.addf %3, %8 : vector<16x64xf32>
    %c0_9 = arith.constant 0 : index
    %c0_10 = arith.constant 0 : index
    %10 = vector.load %arg6[%c0_9, %c0_10] : memref<16x64xf32, #tpu.memory_space<vmem>>, vector<16x64xf32>
    tpu.vector_store %arg6[%c0_9, %c0_10], %9 {strides = array<i32>} : memref<16x64xf32, #tpu.memory_space<vmem>>, vector<16x64xf32>,
    %c3_i32 = arith.constant 3 : i32
    %11 = arith.cmpi eq, %arg2, %c3_i32 : i32
    %12 = arith.extui %11 : i1 to i32
    %c0_i32_11 = arith.constant 0 : i32
    %13 = arith.cmpi ne, %12, %c0_i32_11 : i32
    scf.if %13 {
      %c0_12 = arith.constant 0 : index
      %c0_13 = arith.constant 0 : index
      %14 = vector.load %arg6[%c0_12, %c0_13] : memref<16x64xf32, #tpu.memory_space<vmem>>, vector<16x64xf32>
      %15 = arith.truncf %14 : vector<16x64xf32> to vector<16x64xbf16>
      %c0_14 = arith.constant 0 : index
      %c0_15 = arith.constant 0 : index
      %c0_16 = arith.constant 0 : index
      %16 = vector.load %arg5[%c0_14, %c0_15, %c0_16] : memref<1x16x64xbf16, #tpu.memory_space<vmem>>, vector<1x16x64xbf16>
      %17 = vector.shape_cast %16 : vector<1x16x64xbf16> to vector<16x64xbf16>
      %18 = vector.shape_cast %15 : vector<16x64xbf16> to vector<1x16x64xbf16>
      tpu.vector_store %arg5[%c0_14, %c0_15, %c0_16], %18 {strides = array<i32>} : memref<1x16x64xbf16, #tpu.memory_space<vmem>>, vector<1x16x64xbf16>,
    } else {
    }
    return
  }
  func.func @transform_0(%arg0: i32, %arg1: i32, %arg2: i32) -> (i32, i32, i32, i32) {
    %c0_i32 = arith.constant 0 : i32
    %c0_i32_0 = arith.constant 0 : i32
    %c0_i32_1 = arith.constant 0 : i32
    return %arg0, %arg2, %c0_i32, %c0_i32_0 : i32, i32, i32, i32
  }
  func.func @transform_1(%arg0: i32, %arg1: i32, %arg2: i32) -> (i32, i32, i32) {
    %c0_i32 = arith.constant 0 : i32
    %c0_i32_0 = arith.constant 0 : i32
    return %arg2, %c0_i32, %arg1 : i32, i32, i32
  }
  func.func @transform_2(%arg0: i32, %arg1: i32, %arg2: i32) -> (i32, i32, i32) {
    %c0_i32 = arith.constant 0 : i32
    %c0_i32_0 = arith.constant 0 : i32
    return %arg0, %c0_i32, %arg1 : i32, i32, i32
  }
}

module attributes {stable_mosaic.version = 11 : i64} {
  func.func @_mla_attn_kernel(%arg0: i32, %arg1: i32, %arg2: i32, %arg3: memref<1x1x16x48xbf16, #tpu.memory_space<vmem>>, %arg4: memref<1x8x48xbf16, #tpu.memory_space<vmem>>, %arg5: memref<1x32x32xbf16, #tpu.memory_space<vmem>>, %arg6: memref<1x32x32xbf16, #tpu.memory_space<vmem>>, %arg7: memref<1x1x16x32xbf16, #tpu.memory_space<vmem>>, %arg8: memref<16x48xbf16, #tpu.memory_space<vmem>>, %arg9: memref<16x1xf32, #tpu.memory_space<vmem>>, %arg10: memref<16x1xf32, #tpu.memory_space<vmem>>, %arg11: memref<16x32xf32, #tpu.memory_space<vmem>>) attributes {dimension_semantics = [#tpu.dimension_semantics<parallel>, #tpu.dimension_semantics<parallel>, #tpu.dimension_semantics<arbitrary>], iteration_bounds = array<i64: 4, 2, 2>, scalar_prefetch = 0 : i64, scratch_operands = 4 : i64, tpu.core_type = #tpu.core_type<tc>, window_params = [{transform_indices = @transform_0, window_bounds = array<i64: 1, 1, 16, 48>}, {transform_indices = @transform_1, window_bounds = array<i64: 1, 8, 48>}, {transform_indices = @transform_2, window_bounds = array<i64: 1, 32, 32>}, {transform_indices = @transform_3, window_bounds = array<i64: 1, 32, 32>}, {transform_indices = @transform_4, window_bounds = array<i64: 1, 1, 16, 32>}]} {
    %c0_i32 = arith.constant 0 : i32
    %0 = arith.cmpi eq, %arg2, %c0_i32 : i32
    %1 = arith.extui %0 : i1 to i32
    %c0_i32_0 = arith.constant 0 : i32
    %2 = arith.cmpi ne, %1, %c0_i32_0 : i32
    scf.if %2 {
      %c0_24 = arith.constant 0 : index
      %c0_25 = arith.constant 0 : index
      %c0_26 = arith.constant 0 : index
      %c0_27 = arith.constant 0 : index
      %49 = vector.load %arg3[%c0_24, %c0_25, %c0_26, %c0_27] : memref<1x1x16x48xbf16, #tpu.memory_space<vmem>>, vector<1x1x16x48xbf16>
      %50 = vector.shape_cast %49 : vector<1x1x16x48xbf16> to vector<16x48xbf16>
      %c0_28 = arith.constant 0 : index
      %c0_29 = arith.constant 0 : index
      %c0_30 = arith.constant 0 : index
      %51 = vector.load %arg5[%c0_28, %c0_29, %c0_30] : memref<1x32x32xbf16, #tpu.memory_space<vmem>>, vector<1x32x32xbf16>
      %52 = vector.shape_cast %51 : vector<1x32x32xbf16> to vector<32x32xbf16>
      %53 = vector.extract_strided_slice %50 {offsets = [0, 0], sizes = [16, 32], strides = [1, 1]} : vector<16x48xbf16> to vector<16x32xbf16>
      %cst_31 = arith.constant dense<0.000000e+00> : vector<16x32xf32>
      %54 = tpu.matmul %53, %52, %cst_31 {dimension_numbers = #tpu.dot_dimension_numbers<[1], [0], [0], [1], [0, 0, 1, 1], [], []>} : vector<16x32xbf16>, vector<32x32xbf16>, vector<16x32xf32> -> vector<16x32xf32>
      %55 = arith.truncf %54 : vector<16x32xf32> to vector<16x32xbf16>
      %56 = vector.extract_strided_slice %50 {offsets = [0, 32], sizes = [16, 16], strides = [1, 1]} : vector<16x48xbf16> to vector<16x16xbf16>
      %57 = tpu.concatenate %55, %56 in 1 : vector<16x32xbf16>, vector<16x16xbf16> -> vector<16x48xbf16>
      %c0_32 = arith.constant 0 : index
      %c0_33 = arith.constant 0 : index
      %58 = vector.load %arg8[%c0_32, %c0_33] : memref<16x48xbf16, #tpu.memory_space<vmem>>, vector<16x48xbf16>
      tpu.vector_store %arg8[%c0_32, %c0_33], %57 {strides = array<i32>} : memref<16x48xbf16, #tpu.memory_space<vmem>>, vector<16x48xbf16>,
      %cst_34 = arith.constant 0xFF800000 : f32
      %59 = vector.broadcast %cst_34 : f32 to vector<16x1xf32>
      %c0_35 = arith.constant 0 : index
      %c0_36 = arith.constant 0 : index
      %60 = vector.load %arg9[%c0_35, %c0_36] : memref<16x1xf32, #tpu.memory_space<vmem>>, vector<16x1xf32>
      tpu.vector_store %arg9[%c0_35, %c0_36], %59 {strides = array<i32>} : memref<16x1xf32, #tpu.memory_space<vmem>>, vector<16x1xf32>,
      %cst_37 = arith.constant 0.000000e+00 : f32
      %61 = vector.broadcast %cst_37 : f32 to vector<16x1xf32>
      %c0_38 = arith.constant 0 : index
      %c0_39 = arith.constant 0 : index
      %62 = vector.load %arg10[%c0_38, %c0_39] : memref<16x1xf32, #tpu.memory_space<vmem>>, vector<16x1xf32>
      tpu.vector_store %arg10[%c0_38, %c0_39], %61 {strides = array<i32>} : memref<16x1xf32, #tpu.memory_space<vmem>>, vector<16x1xf32>,
      %cst_40 = arith.constant 0.000000e+00 : f32
      %63 = vector.broadcast %cst_40 : f32 to vector<16x32xf32>
      %c0_41 = arith.constant 0 : index
      %c0_42 = arith.constant 0 : index
      %64 = vector.load %arg11[%c0_41, %c0_42] : memref<16x32xf32, #tpu.memory_space<vmem>>, vector<16x32xf32>
      tpu.vector_store %arg11[%c0_41, %c0_42], %63 {strides = array<i32>} : memref<16x32xf32, #tpu.memory_space<vmem>>, vector<16x32xf32>,
    } else {
    }
    %c0 = arith.constant 0 : index
    %c0_1 = arith.constant 0 : index
    %c0_2 = arith.constant 0 : index
    %3 = vector.load %arg4[%c0, %c0_1, %c0_2] : memref<1x8x48xbf16, #tpu.memory_space<vmem>>, vector<1x8x48xbf16>
    %4 = vector.shape_cast %3 : vector<1x8x48xbf16> to vector<8x48xbf16>
    %c0_3 = arith.constant 0 : index
    %c0_4 = arith.constant 0 : index
    %5 = vector.load %arg8[%c0_3, %c0_4] : memref<16x48xbf16, #tpu.memory_space<vmem>>, vector<16x48xbf16>
    %cst = arith.constant dense<0.000000e+00> : vector<16x8xf32>
    %6 = tpu.matmul %5, %4, %cst {dimension_numbers = #tpu.dot_dimension_numbers<[1], [1], [0], [0], [0, 0, 1, 0], [], []>} : vector<16x48xbf16>, vector<8x48xbf16>, vector<16x8xf32> -> vector<16x8xf32>
    %cst_5 = arith.constant 0.144337565 : f32
    %7 = vector.broadcast %cst_5 : f32 to vector<16x8xf32>
    %8 = arith.mulf %6, %7 : vector<16x8xf32>
    %9 = tpu.iota {dimensions = array<i32: 0>} : vector<16x8xi32>
    %c0_i32_6 = arith.constant 0 : i32
    %10 = vector.broadcast %c0_i32_6 : i32 to vector<16x8xi32>
    %11 = arith.addi %10, %9 : vector<16x8xi32>
    %c8_i32 = arith.constant 8 : i32
    %12 = arith.muli %arg2, %c8_i32 : i32
    %13 = tpu.iota {dimensions = array<i32: 1>} : vector<16x8xi32>
    %14 = vector.broadcast %12 : i32 to vector<16x8xi32>
    %15 = arith.addi %14, %13 : vector<16x8xi32>
    %16 = arith.cmpi sle, %15, %11 : vector<16x8xi32>
    %c16_i32 = arith.constant 16 : i32
    %17 = vector.broadcast %c16_i32 : i32 to vector<16x8xi32>
    %18 = arith.cmpi slt, %15, %17 : vector<16x8xi32>
    %19 = arith.andi %16, %18 : vector<16x8xi1>
    %cst_7 = arith.constant -1.000000e+30 : f32
    %20 = vector.broadcast %cst_7 : f32 to vector<16x8xf32>
    %21 = arith.select %19, %8, %20 : vector<16x8xi1>, vector<16x8xf32>
    %c0_8 = arith.constant 0 : index
    %c0_9 = arith.constant 0 : index
    %22 = vector.load %arg9[%c0_8, %c0_9] : memref<16x1xf32, #tpu.memory_space<vmem>>, vector<16x1xf32>
    %cst_10 = arith.constant dense<0xFF800000> : vector<16xf32>
    %23 = vector.multi_reduction <maximumf>, %21, %cst_10 [1] : vector<16x8xf32> to vector<16xf32>
    %24 = vector.shape_cast %23 : vector<16xf32> to vector<16x1xf32>
    %25 = arith.maximumf %22, %24 : vector<16x1xf32>
    %26 = arith.subf %22, %25 : vector<16x1xf32>
    %27 = math.exp %26 : vector<16x1xf32>
    %28 = vector.broadcast %25 : vector<16x1xf32> to vector<16x8xf32>
    %29 = arith.subf %21, %28 : vector<16x8xf32>
    %30 = math.exp %29 : vector<16x8xf32>
    %c0_11 = arith.constant 0 : index
    %c0_12 = arith.constant 0 : index
    %31 = vector.load %arg10[%c0_11, %c0_12] : memref<16x1xf32, #tpu.memory_space<vmem>>, vector<16x1xf32>
    %32 = arith.mulf %27, %31 : vector<16x1xf32>
    %cst_13 = arith.constant dense<0.000000e+00> : vector<16xf32>
    %33 = vector.multi_reduction <add>, %30, %cst_13 [1] : vector<16x8xf32> to vector<16xf32>
    %34 = vector.shape_cast %33 : vector<16xf32> to vector<16x1xf32>
    %35 = arith.addf %32, %34 : vector<16x1xf32>
    %c0_14 = arith.constant 0 : index
    %c0_15 = arith.constant 0 : index
    %36 = vector.load %arg10[%c0_14, %c0_15] : memref<16x1xf32, #tpu.memory_space<vmem>>, vector<16x1xf32>
    tpu.vector_store %arg10[%c0_14, %c0_15], %35 {strides = array<i32>} : memref<16x1xf32, #tpu.memory_space<vmem>>, vector<16x1xf32>,
    %c0_16 = arith.constant 0 : index
    %c0_17 = arith.constant 0 : index
    %37 = vector.load %arg11[%c0_16, %c0_17] : memref<16x32xf32, #tpu.memory_space<vmem>>, vector<16x32xf32>
    %38 = vector.broadcast %27 : vector<16x1xf32> to vector<16x32xf32>
    %39 = arith.mulf %38, %37 : vector<16x32xf32>
    %40 = arith.truncf %30 : vector<16x8xf32> to vector<16x8xbf16>
    %41 = vector.extract_strided_slice %4 {offsets = [0, 0], sizes = [8, 32], strides = [1, 1]} : vector<8x48xbf16> to vector<8x32xbf16>
    %cst_18 = arith.constant dense<0.000000e+00> : vector<16x32xf32>
    %42 = tpu.matmul %40, %41, %cst_18 {dimension_numbers = #tpu.dot_dimension_numbers<[1], [0], [0], [1], [0, 0, 1, 1], [], []>} : vector<16x8xbf16>, vector<8x32xbf16>, vector<16x32xf32> -> vector<16x32xf32>
    %43 = arith.addf %39, %42 : vector<16x32xf32>
    %c0_19 = arith.constant 0 : index
    %c0_20 = arith.constant 0 : index
    %44 = vector.load %arg11[%c0_19, %c0_20] : memref<16x32xf32, #tpu.memory_space<vmem>>, vector<16x32xf32>
    tpu.vector_store %arg11[%c0_19, %c0_20], %43 {strides = array<i32>} : memref<16x32xf32, #tpu.memory_space<vmem>>, vector<16x32xf32>,
    %c0_21 = arith.constant 0 : index
    %c0_22 = arith.constant 0 : index
    %45 = vector.load %arg9[%c0_21, %c0_22] : memref<16x1xf32, #tpu.memory_space<vmem>>, vector<16x1xf32>
    tpu.vector_store %arg9[%c0_21, %c0_22], %25 {strides = array<i32>} : memref<16x1xf32, #tpu.memory_space<vmem>>, vector<16x1xf32>,
    %c1_i32 = arith.constant 1 : i32
    %46 = arith.cmpi eq, %arg2, %c1_i32 : i32
    %47 = arith.extui %46 : i1 to i32
    %c0_i32_23 = arith.constant 0 : i32
    %48 = arith.cmpi ne, %47, %c0_i32_23 : i32
    scf.if %48 {
      %c0_24 = arith.constant 0 : index
      %c0_25 = arith.constant 0 : index
      %49 = vector.load %arg11[%c0_24, %c0_25] : memref<16x32xf32, #tpu.memory_space<vmem>>, vector<16x32xf32>
      %c0_26 = arith.constant 0 : index
      %c0_27 = arith.constant 0 : index
      %50 = vector.load %arg10[%c0_26, %c0_27] : memref<16x1xf32, #tpu.memory_space<vmem>>, vector<16x1xf32>
      %51 = tpu.reciprocal %50 {approx = true} : vector<16x1xf32> -> vector<16x1xf32>
      %52 = vector.broadcast %51 : vector<16x1xf32> to vector<16x32xf32>
      %53 = arith.mulf %49, %52 : vector<16x32xf32>
      %c0_28 = arith.constant 0 : index
      %c0_29 = arith.constant 0 : index
      %c0_30 = arith.constant 0 : index
      %54 = vector.load %arg6[%c0_28, %c0_29, %c0_30] : memref<1x32x32xbf16, #tpu.memory_space<vmem>>, vector<1x32x32xbf16>
      %55 = vector.shape_cast %54 : vector<1x32x32xbf16> to vector<32x32xbf16>
      %56 = arith.truncf %53 : vector<16x32xf32> to vector<16x32xbf16>
      %cst_31 = arith.constant dense<0.000000e+00> : vector<16x32xf32>
      %57 = tpu.matmul %56, %55, %cst_31 {dimension_numbers = #tpu.dot_dimension_numbers<[1], [0], [0], [1], [0, 0, 1, 1], [], []>} : vector<16x32xbf16>, vector<32x32xbf16>, vector<16x32xf32> -> vector<16x32xf32>
      %58 = arith.truncf %57 : vector<16x32xf32> to vector<16x32xbf16>
      %c0_32 = arith.constant 0 : index
      %c0_33 = arith.constant 0 : index
      %c0_34 = arith.constant 0 : index
      %c0_35 = arith.constant 0 : index
      %59 = vector.load %arg7[%c0_32, %c0_33, %c0_34, %c0_35] : memref<1x1x16x32xbf16, #tpu.memory_space<vmem>>, vector<1x1x16x32xbf16>
      %60 = vector.shape_cast %59 : vector<1x1x16x32xbf16> to vector<16x32xbf16>
      %61 = vector.shape_cast %58 : vector<16x32xbf16> to vector<1x1x16x32xbf16>
      tpu.vector_store %arg7[%c0_32, %c0_33, %c0_34, %c0_35], %61 {strides = array<i32>} : memref<1x1x16x32xbf16, #tpu.memory_space<vmem>>, vector<1x1x16x32xbf16>,
    } else {
    }
    return
  }
  func.func @transform_0(%arg0: i32, %arg1: i32, %arg2: i32) -> (i32, i32, i32, i32) {
    %c0_i32 = arith.constant 0 : i32
    %c0_i32_0 = arith.constant 0 : i32
    %c0_i32_1 = arith.constant 0 : i32
    return %arg1, %arg0, %c0_i32, %c0_i32_0 : i32, i32, i32, i32
  }
  func.func @transform_1(%arg0: i32, %arg1: i32, %arg2: i32) -> (i32, i32, i32) {
    %c0_i32 = arith.constant 0 : i32
    %c0_i32_0 = arith.constant 0 : i32
    return %arg1, %arg2, %c0_i32 : i32, i32, i32
  }
  func.func @transform_2(%arg0: i32, %arg1: i32, %arg2: i32) -> (i32, i32, i32) {
    %c0_i32 = arith.constant 0 : i32
    %c0_i32_0 = arith.constant 0 : i32
    %c0_i32_1 = arith.constant 0 : i32
    return %arg0, %c0_i32, %c0_i32_0 : i32, i32, i32
  }
  func.func @transform_3(%arg0: i32, %arg1: i32, %arg2: i32) -> (i32, i32, i32) {
    %c0_i32 = arith.constant 0 : i32
    %c0_i32_0 = arith.constant 0 : i32
    %c0_i32_1 = arith.constant 0 : i32
    return %arg0, %c0_i32, %c0_i32_0 : i32, i32, i32
  }
  func.func @transform_4(%arg0: i32, %arg1: i32, %arg2: i32) -> (i32, i32, i32, i32) {
    %c0_i32 = arith.constant 0 : i32
    %c0_i32_0 = arith.constant 0 : i32
    %c0_i32_1 = arith.constant 0 : i32
    return %arg1, %arg0, %c0_i32, %c0_i32_0 : i32, i32, i32, i32
  }
}

</mosaic_0001>

<bundles_post_ra>
// kernel: mla_forward.6
= control target key start
LH: loop header
LB: loop body
LE: loop exit
PB: predicated region body
PF: predicated region fallthrough
CT: control target
= control target key end

     0   :  { %vm16_vm0 = vcmask 392192   ;;  %v209_v1 = vmov 0.0   ;;  %vm71_vm1 = vcmask 523264   ;;  %vm159_vm2 = vcmask 388096   ;;  %s263_s1 = inlined_call_operand.vmem [shape: bf16[64,48], index: 1, kind: input, shape index: {}]   ;;  %s264_s0 = inlined_call_operand.vmem [shape: bf16[32,64], index: 0, kind: input, shape index: {}]   ;;  %s265_s2 = inlined_call_operand.vmem [shape: bf16[32,48], index: 2, kind: output, shape index: {}]  }
   0x1   :  { %v203_v0 = vld [vmem:[%s263_s1 + $0x18] sm:$0xff]   ;;  %19 = vst.msk [vmem:[#allocation2 + $0x10] sm:$0xff] %vm16_vm0, %v209_v1  ;;  %17 = vst.msk [vmem:[#allocation2] sm:$0xff] %vm16_vm0, %v209_v1  ;;  %v204_v2 = vld [vmem:[%s263_s1 + $0x10] sm:$0xff]  }
   0x2   :  { %18 = vst.msk [vmem:[#allocation2 + $0x8] sm:$0xff] %vm16_vm0, %v209_v1  ;;  %20 = vst.msk [vmem:[#allocation2 + $0x18] sm:$0xff] %vm16_vm0, %v209_v1  ;;  %190 = vmatprep.subr.bf16.mxu0 %v203_v0  ;;  %v205_v3 = vld [vmem:[%s263_s1 + $0x8] sm:$0xff]   ;;  %v207_v4 = vld [vmem:[%s264_s0] sm:$0xff]  }
   0x3   :  { %191 = vmatpush3.bf16.msra.mxu0 %v203_v0  ;;  %198 = vmatprep.mubr.msk.bf16.mxu0 %vm71_vm1, %v207_v4  ;;  %v206_v5 = vld [vmem:[%s263_s1] sm:$0xff]   ;;  %v208_v6 = vld [vmem:[%s264_s0 + $0x8] sm:$0xff]  }
   0x4   :  { %192 = vmatprep.subr.bf16.mxu0 %v204_v2 }
   0x7   :  { %193 = vmatpush3.bf16.msra.mxu0 %v204_v2 }
   0x8   :  { %194 = vmatprep.subr.bf16.mxu0 %v205_v3  ;;  %v23_v7 = vld [vmem:[#allocation2 + $0x10] sm:$0xff]  ;;  %v21_v9 = vld [vmem:[#allocation2] sm:$0xff] }
   0x9   :  { %v24_v12 = vld [vmem:[#allocation2 + $0x18] sm:$0xff]  ;;  %v22_v15 = vld [vmem:[#allocation2 + $0x8] sm:$0xff] }
   0xb   :  { %195 = vmatpush3.bf16.msra.mxu0 %v205_v3 }
   0xc   :  { %196 = vmatprep.subr.bf16.mxu0 %v206_v5 }
   0xf   :  { %197 = vmatpush3.bf16.msra.mxu0 %v206_v5 }
  0x12   :  { %199 = vmatmul.mubr.msk.bf16.vlgmr.msra.gmra.mxu0 %vm71_vm1, %v208_v6 }
  0xd2   :  { %v200_v8 = vpop.f32.mrf.mxu0 }
  0xd3   :  { %v129_v10 = vadd.f32 %v200_v8, %v23_v7 }
  0xd4   :  { %v112_v11 = vpop.f32.mrf.mxu0 }
  0xd5   :  { %134 = vst.msk [vmem:[#allocation2 + $0x10] sm:$0xff] %vm16_vm0, %v129_v10  ;;  %v127_v13 = vadd.f32 %v112_v11, %v21_v9 }
  0xd6   :  { %v201_v14 = vpop.f32.mrf.mxu0 }
  0xd7   :  { %132 = vst.msk [vmem:[#allocation2] sm:$0xff] %vm16_vm0, %v127_v13  ;;  %v130_v16 = vadd.f32 %v201_v14, %v24_v12 }
  0xd8   :  { %v115_v17 = vpop.f32.mrf.mxu0 }
  0xd9   :  { %135 = vst.msk [vmem:[#allocation2 + $0x18] sm:$0xff] %vm16_vm0, %v130_v16  ;;  %v128_v18 = vadd.f32 %v115_v17, %v22_v15 }
  0xdb   :  { %133 = vst.msk [vmem:[#allocation2 + $0x8] sm:$0xff] %vm16_vm0, %v128_v18 }
  0xdc   :  { %v141_v19 = vld [vmem:[#allocation2 + $0x10] sm:$0xff] }
  0xdd   :  { %v182_v20 = vpack.c.bf16 %v141_v19, %v141_v19 }
  0xde   :  { %v139_v21 = vld [vmem:[#allocation2] sm:$0xff] }
  0xdf   :  { %162 = vst.msk [vmem:[%s265_s2 + $0x8] sm:$0xf] %vm159_vm2, %v182_v20  ;;  %v180_v22 = vpack.c.bf16 %v139_v21, %v139_v21 }
  0xe0   :  { %v142_v23 = vld [vmem:[#allocation2 + $0x18] sm:$0xff] }
  0xe1   :  { %160 = vst.msk [vmem:[%s265_s2] sm:$0xf] %vm159_vm2, %v180_v22  ;;  %v183_v24 = vpack.c.bf16 %v142_v23, %v142_v23 }
  0xe2   :  { %v140_v25 = vld [vmem:[#allocation2 + $0x8] sm:$0xff] }
  0xe3   :  { %163 = vst.msk [vmem:[%s265_s2 + $0xc] sm:$0xf] %vm159_vm2, %v183_v24  ;;  %v181_v26 = vpack.c.bf16 %v140_v25, %v140_v25 }
  0xe5   :  { %161 = vst.msk [vmem:[%s265_s2 + $0x4] sm:$0xf] %vm159_vm2, %v181_v26 }

// kernel: mla_forward.7
= control target key start
LH: loop header
LB: loop body
LE: loop exit
PB: predicated region body
PF: predicated region fallthrough
CT: control target
= control target key end

     0   :  { %vm23_vm0 = vcmask 261120   ;;  %vm108_vm9 = vcmask 257024   ;;  %s207_s0 = inlined_call_operand.vmem [shape: bf16[32,32], index: 0, kind: input, shape index: {}]   ;;  %s208_s1 = inlined_call_operand.vmem [shape: f32[1,32], index: 1, kind: input, shape index: {}]   ;;  %s209_s2 = inlined_call_operand.vmem [shape: bf16[32,32], index: 2, kind: output, shape index: {}]  }
   0x1   :  { %v134_v0 = vld [vmem:[%s207_s0 + $0x8] sm:$0xff]   ;;  %v127_v1 = vld [vmem:[%s207_s0] sm:$0xff]  }
   0x2   :  { %v172_v2 = vunpack.c.l.bf16 %v134_v0  ;;  %v174_v3 = vunpack.c.l.bf16 %v127_v1  ;;  %v176_v4 = vunpack.c.h.bf16 %v134_v0  ;;  %v178_v5 = vunpack.c.h.bf16 %v127_v1  ;;  %v117_v47 = vld [vmem:[%s208_s1] ss:$0 sm:$0xff] }
   0x4   :  { %v21_v6 = vmul.f32 %v172_v2, %v172_v2  ;;  %v19_v7 = vmul.f32 %v174_v3, %v174_v3  ;;  %v22_v8 = vmul.f32 %v176_v4, %v176_v4  ;;  %v20_v9 = vmul.f32 %v178_v5, %v178_v5 }
   0x6   :  { %v30_v10 = vsel %vm23_vm0, %v21_v6, 0.0  ;;  %v24_v11 = vsel %vm23_vm0, %v19_v7, 0.0  ;;  %v33_v12 = vsel %vm23_vm0, %v22_v8, 0.0  ;;  %v27_v13 = vsel %vm23_vm0, %v20_v9, 0.0 }
   0x7   :  { %31 = vadd.xlane.f32.xlu1 %v30_v10  ;;  %25 = vadd.xlane.f32.xlu0 %v24_v11 }
   0xb   :  { %34 = vadd.xlane.f32.xlu1 %v33_v12  ;;  %28 = vadd.xlane.f32.xlu0 %v27_v13 }
  0x90   :  { %v32_v14 = vpop.xlane.xlu1 %31  ;;  %v26_v15 = vpop.xlane.xlu0 %25 }
  0x91   :  { %v39_v16 = vmul.f32 0.03125, %v32_v14  ;;  %v37_v17 = vmul.f32 0.03125, %v26_v15 }
  0x93   :  { %v43_v18 = vadd.f32 1e-06, %v39_v16  ;;  %v41_v19 = vadd.f32 1e-06, %v37_v17 }
  0x94   :  { %v35_v20 = vpop.xlane.xlu1 %34  ;;  %v29_v21 = vpop.xlane.xlu0 %28 }
  0x95   :  { %135 = vrsqrt.f32 %v43_v18  ;;  %v40_v22 = vmul.f32 0.03125, %v35_v20  ;;  %v38_v23 = vmul.f32 0.03125, %v29_v21  ;;  %vm61_vm1 = vcmp.eq.f32.partialorder %v43_v18, inf }
  0x96   :  { %137 = vrsqrt.f32 %v41_v19  ;;  %v64_v29 = vand.u32 2147483648, %v43_v18  ;;  %vm63_vm2 = vcmp.eq.f32.partialorder %v43_v18, 0.0  ;;  %vm47_vm3 = vcmp.eq.f32.partialorder %v41_v19, inf }
  0x97   :  { %v44_v24 = vadd.f32 1e-06, %v40_v22  ;;  %v42_v25 = vadd.f32 1e-06, %v38_v23  ;;  %v50_v32 = vand.u32 2147483648, %v41_v19  ;;  %vm49_vm4 = vcmp.eq.f32.partialorder %v41_v19, 0.0 }
  0x99   :  { %139 = vrsqrt.f32 %v44_v24  ;;  %vm68_vm5 = vcmp.eq.f32.partialorder %v44_v24, inf  ;;  %v71_v39 = vand.u32 2147483648, %v44_v24  ;;  %vm70_vm6 = vcmp.eq.f32.partialorder %v44_v24, 0.0 }
  0x9a   :  { %141 = vrsqrt.f32 %v42_v25  ;;  %vm54_vm7 = vcmp.eq.f32.partialorder %v42_v25, inf  ;;  %v57_v42 = vand.u32 2147483648, %v42_v25  ;;  %vm56_vm8 = vcmp.eq.f32.partialorder %v42_v25, 0.0 }
  0xa2   :  { %v136_v26 = vpop.eup %135 }
  0xa3   :  { %v138_v27 = vpop.eup %137  ;;  %v60_v28 = vmul.f32 %v136_v26, %v43_v18 }
  0xa4   :  { %v46_v30 = vmul.f32 %v138_v27, %v41_v19 }
  0xa5   :  { %v62_v31 = vsel %vm61_vm1, %v43_v18, %v60_v28 }
  0xa6   :  { %v65_v33 = vsel %vm63_vm2, %v64_v29, %v62_v31  ;;  %v48_v34 = vsel %vm47_vm3, %v41_v19, %v46_v30  ;;  %v140_v36 = vpop.eup %139 }
  0xa7   :  { %143 = vrcp.f32 %v65_v33  ;;  %v51_v35 = vsel %vm49_vm4, %v50_v32, %v48_v34  ;;  %v142_v37 = vpop.eup %141  ;;  %v67_v38 = vmul.f32 %v140_v36, %v44_v24 }
  0xa8   :  { %145 = vrcp.f32 %v51_v35  ;;  %v53_v40 = vmul.f32 %v142_v37, %v42_v25 }
  0xa9   :  { %v69_v41 = vsel %vm68_vm5, %v44_v24, %v67_v38 }
  0xaa   :  { %v72_v43 = vsel %vm70_vm6, %v71_v39, %v69_v41  ;;  %v55_v44 = vsel %vm54_vm7, %v42_v25, %v53_v40 }
  0xab   :  { %147 = vrcp.f32 %v72_v43  ;;  %v58_v45 = vsel %vm56_vm8, %v57_v42, %v55_v44 }
  0xac   :  { %149 = vrcp.f32 %v58_v45 }
  0xb4   :  { %v144_v46 = vpop.eup %143 }
  0xb5   :  { %v146_v48 = vpop.eup %145  ;;  %v78_v49 = vmul.f32 %v144_v46, %v172_v2 }
  0xb6   :  { %v74_v50 = vmul.f32 %v146_v48, %v174_v3 }
  0xb7   :  { %v90_v51 = vmul.f32 %v117_v47, %v78_v49 }
  0xb8   :  { %v88_v52 = vmul.f32 %v117_v47, %v74_v50  ;;  %v148_v54 = vpop.eup %147 }
  0xb9   :  { %v124_v53 = vpack.c.bf16 %v90_v51, %v90_v51  ;;  %v150_v56 = vpop.eup %149  ;;  %v80_v57 = vmul.f32 %v148_v54, %v176_v4 }
  0xba   :  { %v122_v55 = vpack.c.bf16 %v88_v52, %v88_v52  ;;  %v76_v58 = vmul.f32 %v150_v56, %v178_v5 }
  0xbb   :  { %111 = vst.msk [vmem:[%s209_s2 + $0x8] sm:$0xf] %vm108_vm9, %v124_v53  ;;  %v91_v59 = vmul.f32 %v117_v47, %v80_v57 }
  0xbc   :  { %109 = vst.msk [vmem:[%s209_s2] sm:$0xf] %vm108_vm9, %v122_v55  ;;  %v89_v60 = vmul.f32 %v117_v47, %v76_v58 }
  0xbd   :  { %v125_v61 = vpack.c.bf16 %v91_v59, %v91_v59 }
  0xbe   :  { %v123_v62 = vpack.c.bf16 %v89_v60, %v89_v60 }
  0xbf   :  { %112 = vst.msk [vmem:[%s209_s2 + $0xc] sm:$0xf] %vm108_vm9, %v125_v61 }
  0xc0   :  { %110 = vst.msk [vmem:[%s209_s2 + $0x4] sm:$0xf] %vm108_vm9, %v123_v62 }

// kernel: mla_forward.5
= control target key start
LH: loop header
LB: loop body
LE: loop exit
PB: predicated region body
PF: predicated region fallthrough
CT: control target
= control target key end

     0   :  { %vm17_vm0 = vcmask 523264   ;;  %v261_v1 = vmov 0   ;;  %v262_v2 = vmov 0.0   ;;  %vm206_vm1 = vcmask 1043456   ;;  %s330_s1 = inlined_call_operand.vmem [shape: bf16[64,192], index: 1, kind: input, shape index: {}]   ;;  %s331_s0 = inlined_call_operand.vmem [shape: bf16[32,64], index: 0, kind: input, shape index: {}]   ;;  %s332_s2 = inlined_call_operand.vmem [shape: bf16[32,192], index: 2, kind: output, shape index: {}]  }
   0x1   :  { %v247_v0 = vld [vmem:[%s330_s1 + $0x34] ss:$8 sps:$4 sm:$0xff]   ;;  %134 = vmatprep.mubr.bf16.mxu0 %v261_v1  ;;  %144 = vmatprep.mubr.bf16.mxu1 %v261_v1  ;;  %18 = vst.msk [vmem:[#allocation2 + $0x8] sm:$0xff] %vm17_vm0, %v262_v2  ;;  %20 = vst.msk [vmem:[#allocation2 + $0x18] sm:$0xff] %vm17_vm0, %v262_v2  ;;  %v249_v3 = vld [vmem:[%s330_s1 + $0x30] ss:$8 sps:$4 sm:$0xff]  }
   0x2   :  { %22 = vst.msk [vmem:[#allocation2 + $0x28] sm:$0xff] %vm17_vm0, %v262_v2  ;;  %24 = vst.msk [vmem:[#allocation2 + $0x38] sm:$0xff] %vm17_vm0, %v262_v2  ;;  %110 = vmatprep.subr.bf16.mxu0 %v247_v0  ;;  %237 = vmatprep.subr.bf16.mxu1 %v247_v0  ;;  %v250_v4 = vld [vmem:[%s330_s1 + $0x24] ss:$8 sps:$4 sm:$0xff]   ;;  %v252_v5 = vld [vmem:[%s330_s1 + $0x20] ss:$8 sps:$4 sm:$0xff]  }
   0x3   :  { %111 = vmatpush1.bf16.msra.mxu0 %v249_v3  ;;  %241 = vmatpush1.bf16.msra.mxu1 %v249_v3  ;;  %v253_v6 = vld [vmem:[%s330_s1 + $0x14] ss:$8 sps:$4 sm:$0xff]   ;;  %v255_v7 = vld [vmem:[%s330_s1 + $0x10] ss:$8 sps:$4 sm:$0xff]   ;;  %v256_v8 = vld [vmem:[%s330_s1 + $0x4] ss:$8 sps:$4 sm:$0xff]  }
   0x4   :  { %112 = vmatprep.subr.bf16.mxu0 %v250_v4  ;;  %238 = vmatprep.subr.bf16.mxu1 %v250_v4  ;;  %v258_v9 = vld [vmem:[%s330_s1] ss:$8 sps:$4 sm:$0xff]   ;;  %vm207_vm2 = vcmask 523268  }
   0x5   :  { %v259_v10 = vld [vmem:[%s331_s0] sm:$0xff]   ;;  %v260_v11 = vld [vmem:[%s331_s0 + $0x8] sm:$0xff]   ;;  %vm208_vm3 = vmor %vm207_vm2, %vm206_vm1 }
   0x7   :  { %113 = vmatpush1.bf16.msra.mxu0 %v252_v5  ;;  %242 = vmatpush1.bf16.msra.mxu1 %v252_v5 }
   0x8   :  { %114 = vmatprep.subr.bf16.mxu0 %v253_v6  ;;  %239 = vmatprep.subr.bf16.mxu1 %v253_v6  ;;  %v26_v14 = vld [vmem:[#allocation2 + $0x8] sm:$0xff]  ;;  %v28_v22 = vld [vmem:[#allocation2 + $0x18] sm:$0xff] }
   0x9   :  { %v30_v15 = vld [vmem:[#allocation2 + $0x28] sm:$0xff]  ;;  %v32_v23 = vld [vmem:[#allocation2 + $0x38] sm:$0xff] }
   0xb   :  { %115 = vmatpush1.bf16.msra.mxu0 %v255_v7  ;;  %243 = vmatpush1.bf16.msra.mxu1 %v255_v7 }
   0xc   :  { %116 = vmatprep.subr.bf16.mxu0 %v256_v8  ;;  %240 = vmatprep.subr.bf16.mxu1 %v256_v8 }
   0xf   :  { %117 = vmatpush1.bf16.msra.mxu0 %v258_v9  ;;  %244 = vmatpush1.bf16.msra.mxu1 %v258_v9 }
  0x12   :  { %227 = vmatmul.mubr.msk.bf16.vlgmr.msra.gmra.mxu0 %vm17_vm0, %v259_v10  ;;  %228 = vmatmul.mubr.msk.bf16.vlgmr.msra.gmra.mxu1 %vm17_vm0, %v260_v11 }
  0xd2   :  { %v136_v12 = vpop.f32.mrf.mxu0  ;;  %v146_v13 = vpop.f32.mrf.mxu1 }
  0xd4   :  { %v138_v16 = vpop.f32.mrf.mxu0  ;;  %v148_v17 = vpop.f32.mrf.mxu1 }
  0xd5   :  { %v156_v18 = vadd.f32 %v138_v16, %v26_v14  ;;  %v160_v19 = vadd.f32 %v148_v17, %v30_v15 }
  0xd6   :  { %v140_v20 = vpop.f32.mrf.mxu0  ;;  %v150_v21 = vpop.f32.mrf.mxu1 }
  0xd7   :  { %164 = vst.msk [vmem:[#allocation2 + $0x8] sm:$0xff] %vm17_vm0, %v156_v18  ;;  %168 = vst.msk [vmem:[#allocation2 + $0x28] sm:$0xff] %vm17_vm0, %v160_v19 }
  0xd8   :  { %v142_v24 = vpop.f32.mrf.mxu0  ;;  %v152_v25 = vpop.f32.mrf.mxu1 }
  0xd9   :  { %v158_v26 = vadd.f32 %v142_v24, %v28_v22  ;;  %v162_v27 = vadd.f32 %v152_v25, %v32_v23 }
  0xdb   :  { %166 = vst.msk [vmem:[#allocation2 + $0x18] sm:$0xff] %vm17_vm0, %v158_v26  ;;  %170 = vst.msk [vmem:[#allocation2 + $0x38] sm:$0xff] %vm17_vm0, %v162_v27 }
  0xde   :  { %v175_v28 = vld [vmem:[#allocation2 + $0x8] sm:$0xff] }
  0xdf   :  { %v179_v29 = vld [vmem:[#allocation2 + $0x28] sm:$0xff]  ;;  %v233_v30 = vpack.c.bf16 %v175_v28, %v136_v12 }
  0xe0   :  { %v235_v31 = vpack.c.bf16 %v179_v29, %v146_v13 }
  0xe1   :  { %209 = vst.msk [vmem:[%s332_s2] sm:$0xff] %vm208_vm3, %v233_v30 }
  0xe2   :  { %211 = vst.msk [vmem:[%s332_s2 + $0x10] sm:$0xff] %vm208_vm3, %v235_v31  ;;  %v177_v32 = vld [vmem:[#allocation2 + $0x18] sm:$0xff] }
  0xe3   :  { %v181_v33 = vld [vmem:[#allocation2 + $0x38] sm:$0xff]  ;;  %v234_v34 = vpack.c.bf16 %v177_v32, %v140_v20 }
  0xe4   :  { %v236_v35 = vpack.c.bf16 %v181_v33, %v150_v21 }
  0xe5   :  { %210 = vst.msk [vmem:[%s332_s2 + $0x8] sm:$0xff] %vm208_vm3, %v234_v34 }
  0xe6   :  { %212 = vst.msk [vmem:[%s332_s2 + $0x18] sm:$0xff] %vm208_vm3, %v236_v35 }

// kernel: mla_forward.9
= control target key start
LH: loop header
LB: loop body
LE: loop exit
PB: predicated region body
PF: predicated region fallthrough
CT: control target
= control target key end

     0   :  { %7 = vsyncpa [#allocation4], 0  ;;  %s811_s0 = inlined_call_operand.vmem [shape: bf16[2,4,16,32], index: 0, kind: input, shape index: {}]   ;;  %s812_s1 = inlined_call_operand.vmem [shape: bf16[4,32,64], index: 1, kind: input, shape index: {}]   ;;  %s813_s2 = inlined_call_operand.hbm [shape: bf16[2,16,64], index: 2, kind: output, shape index: {}]  }
   0x1   :  { %9 = vsyncpa [#allocation4 + $0x1], 0  ;;  %s661_s9 = smov 0   ;;  %s663_s10 = smov 0  }
   0x2   :  { %s665_s11 = smov 0   ;;  %s667_s12 = smov 0  }
   0x3   :  { %s669_s13 = smov 0   ;;  %s671_s14 = smov 0  }
   0x4   :  { %s673_s15 = smov 0   ;;  %s675_s16 = smov 0  }
   0x5 LB: > { %s428_s17 = sadd.s32 4294967295, %s638_s16   ;;  %s429_s18 = sadd.s32 4294967294, %s638_s16   ;;  %s638_s16 = sphi %s675_s16, %s15_s16   ;;  %s634_s15 = sphi %s673_s15, %s825_s15   ;;  %s630_s14 = sphi %s671_s14, %s824_s14   ;;  %s626_s13 = sphi %s669_s13, %s823_s13   ;;  %s622_s12 = sphi %s667_s12, %s822_s12   ;;  %s618_s11 = sphi %s665_s11, %s821_s11   ;;  %s614_s10 = sphi %s663_s10, %s820_s10   ;;  %s610_s9 = sphi %s661_s9, %s819_s9  }
   0x6   : > { %s27_s19 = sadd.s32 1, %s630_s14  ;;  %s34_s20 = sadd.s32 1, %s634_s15 }
   0x7   : > { %p28_p0 = scmp.ge.s32.totalorder %s27_s19, 4  ;;  %p109_p1 = scmp.ne.s32.totalorder %s618_s11, %s614_s10 }
   0x8   : > { %p110_p2 = scmp.eq.s32.totalorder %s428_s17, 7  ;;  %p115_p4 = scmp.ne.s32.totalorder %s614_s10, %s610_s9 }
   0x9   : > { %s827_s19 = smov (%p28_p0, %s27_s19), 0  ;;  %s829_s20 = smov (!%p28_p0, %s34_s20), %s634_s15 }
   0xa   : > { %p710_p3 = por %p110_p2, %p109_p1  ;;  %p36_p5 = scmp.ge.s32.totalorder %s829_s20, 2 }
   0xb   : > { %p116_p6 = scmp.eq.s32.totalorder %s429_s18, 7  ;;  %p432_p7 = scmp.ge.s32.totalorder %s638_s16, 1 }
   0xc   : > { %p157_p8 = scmp.lt.s32.totalorder %s638_s16, 9  ;;  %s831_s20 = smov (%p36_p5, %s829_s20), 0 }
   0xd   : > { %816 = sst [smem:[#allocation6_spill]] %s831_s20  ;;  %p720_p9 = por %p116_p6, %p115_p4 }
   0xe   : > { %p158_p10 = pnand %p432_p7, %p157_p8  ;;  %s94_s23 = ssub.s32 %s634_s15, %s831_s20 }
   0xf   : > { %s99_s24 = sadd.s32 1, %s618_s11  ;;  %p97_p11 = scmp.eq.s32.totalorder %s94_s23, 0 }
  0x10   : > { %161 = sbr.rel (%p158_p10) target bundleno = 273 (0x111), region = 28  ;;  %s188_s26 = sand.u32 (!%p158_p10), 1, %s614_s10  }
  0x11   : > { %s728_s25 = scalar_select %p97_p11, %s618_s11, %s99_s24  }
  0x12   : > { %p191_p12 = scmp.lt.s32.totalorder (!%p158_p10), %s626_s13, 1  ;;  %s433_s27 = sshll.u32 (!%p158_p10), %s188_s26, 3 }
  0x13   : > { %p193_p13 = scmp.lt.s32.totalorder (!%p158_p10), %s622_s12, 3  ;;  %s743_s20 = scalar_lea.vmem (!%p158_p10), [#allocation3], %s433_s27 }
  0x14   : > { %p439_p0 = scmp.ne.s32.totalorder (!%p158_p10), %s622_s12, 0 }
  0x15   : > { %s192_s28 = scalar_select %p191_p12, %s626_s13, 1 }
  0x16   : > { %s194_s29 = scalar_select %p193_p13, %s622_s12, 3 }
  0x17   : > { %s435_s30 = sshll.u32 %s192_s28, 3  ;;  %212 = sbr.rel (%p439_p0) target bundleno = 30 (0x1e), region = 32 }
  0x18   : > { %s434_s3 = sshll.u32 %s194_s29, 1  ;;  %s452_s4 = sshll.u32 %s194_s29, 4 }
  0x19   : > { %s197_s5 = sadd.s32 %s435_s30, %s434_s3  ;;  %s207_s8 = scalar_lea.vmem %s812_s1, %s452_s4 }
  0x1a   : > { %s436_s17 = sshll.u32 %s197_s5, 2 }
  0x1b   : > { %s199_s24 = scalar_lea.vmem %s811_s0, %s436_s17 }
  0x1c   : > { %vm213_vm0 = vcmask 523264   ;;  %v640_v0 = vmov 0.0  }
  0x1d   : > { %214 = vst.msk [vmem:[#allocation2] sm:$0xff] %vm213_vm0, %v640_v0  ;;  %215 = vst.msk [vmem:[#allocation2 + $0x8] sm:$0xff] %vm213_vm0, %v640_v0 }
  0x1e PF: > { %v543_v1 = vld [vmem:[%s207_s8 + $0x8] sm:$0xff]   ;;  %v641_v2 = vmov 0.0   ;;  %v544_v3 = vld [vmem:[%s207_s8] sm:$0xff]   ;;  %vm642_vm1 = vmmov 0   ;;  %vm241_vm2 = vcmask 261120   ;;  %vm288_vm3 = vcmask 523264  }
  0x1f   : > { %459 = vmatprep.subr.bf16.mxu0 %v641_v2  ;;  %463 = vmatprep.mubr.msk.bf16.mxu0 %vm642_vm1, %v641_v2  ;;  %v545_v4 = vld [vmem:[%s199_s24] sm:$0xff]   ;;  %p444_p1 = scmp.ne.s32.totalorder %s622_s12, 3 }
  0x20   : > { %460 = vmatpush3.bf16.msra.mxu0 %v543_v1 }
  0x21   : > { %461 = vmatprep.subr.bf16.mxu0 %v641_v2 }
  0x24   : > { %462 = vmatpush3.bf16.msra.mxu0 %v544_v3  ;;  %v216_v5 = vld [vmem:[#allocation2] sm:$0xff]  ;;  %v217_v9 = vld [vmem:[#allocation2 + $0x8] sm:$0xff] }
  0x27   : > { %464 = vmatmul.mubr.msk.bf16.vlgmr.msra.gmra.mxu0 %vm241_vm2, %v545_v4 }
  0xe7   : > { %v279_v6 = vpop.f32.mrf.mxu0 }
  0xe8   : > { %v286_v7 = vadd.f32 %v279_v6, %v216_v5 }
  0xe9   : > { %v465_v8 = vpop.f32.mrf.mxu0 }
  0xea   : > { %289 = vst.msk [vmem:[#allocation2] sm:$0xff] %vm288_vm3, %v286_v7  ;;  %294 = sbr.rel (%p444_p1) target bundleno = 249 (0xf9), region = 36 }
  0xeb   : > { %v282_v10 = vpop.f32.mrf.mxu0 }
  0xec   : > { %v287_v11 = vadd.f32 %v282_v10, %v217_v9 }
  0xed   : > { %v466_v12 = vpop.f32.mrf.mxu0 }
  0xee   : > { %290 = vst.msk [vmem:[#allocation2 + $0x8] sm:$0xff] %vm288_vm3, %v287_v11 }
  0xef   : > { %vm305_vm4 = vcmask 519168  }
  0xf1   : > { %v295_v13 = vld [vmem:[#allocation2] sm:$0xff] }
  0xf2   : > { %v453_v15 = vpack.c.bf16 %v295_v13, %v295_v13 }
  0xf4   : > { %306 = vst.msk [vmem:[%s743_s20] sm:$0xf] %vm305_vm4, %v453_v15 }
  0xf5   : > { %v296_v14 = vld [vmem:[#allocation2 + $0x8] sm:$0xff] }
  0xf6   : > { %v454_v16 = vpack.c.bf16 %v296_v14, %v296_v14 }
  0xf8   : > { %307 = vst.msk [vmem:[%s743_s20 + $0x4] sm:$0xf] %vm305_vm4, %v454_v16 }
  0xf9 PF: > { %s455_s27 = sshll.u32 %s626_s13, 7  ;;  %s323_s30 = sshll.u32 %s743_s20, 4  ;;  %s756_s30 = int_to_ptr.vmem [resolvable:$true] %s323_s30 }
  0xfa   : > { %s753_s12 = scalar_lea.hbm %s813_s2, %s455_s27  ;;  %s760_s3 = scalar_lea.sflag [#allocation4], %s188_s26 }
  0xfb   : > { %s546_s4 = scalar_lea.vmem %s756_s30, 128  ;;  %s643_s13 = smov [#allocation3]  }
  0xfc   : > { %p547_p2 = scmp.ne.s32.totalorder %s756_s30, %s546_s4  ;;  %s550_s5 = sshll.u32 %s643_s13, 4  ;;  %s551_s5 = int_to_ptr.vmem [resolvable:$false] %s550_s5 }
  0xfd   : > { %s552_s6 = scalar_lea.vmem %s551_s5, 256  ;;  %p553_p6 = scmp.lt.s32.totalorder %s756_s30, %s551_s5 }
  0xfe   : > { %p548_p4 = pnand %p547_p2, %p710_p3  ;;  %p554_p7 = scmp.lt.s32.totalorder %s552_s6, %s546_s4 }
 0x100   : > { %p549_p5 = pneg %p548_p4  ;;  %p555_p8 = por %p554_p7, %p553_p6 }
 0x102   : > { %p556_p10 = pnand %p555_p8, %p549_p5 }
 0x104   : > { %559 = shalt.err (!%p556_p10)
}
 0x105   : > { %s560_s20 = scalar_lea.hbm %s753_s12, 128  ;;  %s564_s8 = scalar_lea.hbm %s813_s2, 256 }
 0x106   : > { %p561_p11 = scmp.ne.s32.totalorder %s753_s12, %s560_s20  ;;  %p565_p0 = scmp.lt.s32.totalorder %s753_s12, %s813_s2 }
 0x107   : > { %p566_p1 = scmp.lt.s32.totalorder %s564_s8, %s560_s20 }
 0x108   : > { %p562_p12 = pnand %p561_p11, %p710_p3 }
 0x109   : > { %p567_p2 = por %p566_p1, %p565_p0 }
 0x10a   : > { %p563_p13 = pneg %p562_p12 }
 0x10c   : > { %p568_p4 = pnand %p567_p2, %p563_p13 }
 0x10e   : > { %571 = shalt.err (!%p568_p4)
}
 0x10f   : > { %s644_s23 = smov 64   ;;  %s645_s24 = smov 4  }
 0x110   : > { %467 = dma.vmem_to_hbm [thread:$0]  (%p710_p3), %s756_s30, 128, %s753_s12, %s760_s3, %s644_s23, %s644_s23, %s645_s24  }
 0x111 PF: > { %p473_p5 = scmp.ge.s32.totalorder %s638_s16, 2  ;;  %s338_s27 = sand.u32 1, %s610_s9  }
 0x112   : > { %s339_s28 = scalar_lea.sflag [#allocation4], %s338_s27 }
 0x113   : > { %p470_p6 = pnand %p473_p5, %p720_p9 }
 0x115   : > { %p471_p7 = pneg %p470_p6 }
 0x117   : > { %605 = dma.done.wait (%p471_p7), %s339_s28, 128  }
 0x118   : > { %607 = vsyncadd (%p471_p7), %s339_s28, 4294967168  ;;  %s15_s16 = sadd.s32 1, %s638_s16   ;;  %s818_s21 = sld [smem:[#allocation6_spill]] }
 0x119   : > { %p12_p8 = scmp.ge.s32.totalorder %s15_s16, 10   ;;  %s819_s9 = smov %s614_s10 }
 0x11a   : > { %s820_s10 = smov %s618_s11  ;;  %s821_s11 = smov %s728_s25 }
 0x11b   : > { %s822_s12 = smov %s630_s14  ;;  %s823_s13 = smov %s634_s15 }
 0x11c   : > { %s824_s14 = smov %s827_s19  ;;  %14 = sbr.rel (!%p12_p8) target bundleno = 5 (0x5), region = 74 }
 0x11e   : > { %s825_s15 = smov %s818_s21 }
 0x121   :  { %344 = vsyncpa [#allocation4], 1 }
 0x122   :  { %346 = vsyncpa [#allocation4 + $0x1], 1 }

// kernel: mla_forward.8
= control target key start
LH: loop header
LB: loop body
LE: loop exit
PB: predicated region body
PF: predicated region fallthrough
CT: control target
= control target key end

     0   :  { %s1086_s15 = smov 0   ;;  %s1088_s16 = smov 0   ;;  %s1194_s0 = inlined_call_operand.vmem [shape: bf16[2,4,16,48], index: 0, kind: input, shape index: {}]   ;;  %s1195_s1 = inlined_call_operand.vmem [shape: bf16[2,32,48], index: 1, kind: input, shape index: {}]   ;;  %s1196_s2 = inlined_call_operand.vmem [shape: bf16[4,32,32], index: 2, kind: input, shape index: {}]   ;;  %s1197_s3 = inlined_call_operand.vmem [shape: bf16[4,32,32], index: 3, kind: input, shape index: {}]   ;;  %s1198_s4 = inlined_call_operand.vmem [shape: bf16[2,4,16,32], index: 4, kind: output, shape index: {}]  }
   0x1   :  { %s1090_s17 = smov 0   ;;  %s1092_s18 = smov 0  }
   0x2   :  { %s1094_s19 = smov 0   ;;  %s1096_s20 = smov 0  }
   0x3   :  { %s1098_s21 = smov 0  }
   0x4 LB: > { %s26_s22 = sadd.s32 1, %s1038_s18  ;;  %s29_s23 = sadd.s32 1, %s1042_s19  ;;  %s1050_s21 = sphi %s1098_s21, %s14_s21   ;;  %s1046_s20 = sphi %s1096_s20, %s1206_s20   ;;  %s1042_s19 = sphi %s1094_s19, %s1205_s19   ;;  %s1038_s18 = sphi %s1092_s18, %s1204_s18   ;;  %s1034_s17 = sphi %s1090_s17, %s1203_s17   ;;  %s1030_s16 = sphi %s1088_s16, %s1202_s16   ;;  %s1026_s15 = sphi %s1086_s15, %s1201_s15  }
   0x5   : > { %p27_p0 = scmp.ge.s32.totalorder %s26_s22, 2  ;;  %p836_p1 = scmp.ge.s32.totalorder %s1050_s21, 1 }
   0x6   : > { %p224_p2 = scmp.lt.s32.totalorder %s1050_s21, 17  ;;  %s33_s24 = sadd.s32 1, %s1046_s20 }
   0x7   : > { %s1208_s22 = smov (%p27_p0, %s26_s22), 0  ;;  %s1210_s23 = smov (!%p27_p0, %s29_s23), %s1042_s19 }
   0x8   : > { %p225_p3 = pnand %p836_p1, %p224_p2  ;;  %p31_p4 = scmp.ge.s32.totalorder %s1210_s23, 2 }
   0x9   : > { %p276_p6 = scmp.lt.s32.totalorder (!%p225_p3), %s1030_s16, 1  ;;  %p278_p7 = scmp.lt.s32.totalorder (!%p225_p3), %s1034_s17, 3 }
   0xa   : > { %s1212_s23 = smov (%p31_p4, %s1210_s23), 0  ;;  %s1214_s24 = smov (!%p31_p4, %s33_s24), %s1046_s20 }
   0xb   : > { %p35_p5 = scmp.ge.s32.totalorder %s1214_s24, 4  ;;  %228 = sbr.rel (%p225_p3) target bundleno = 1281 (0x501), region = 36 }
   0xc   : > { %p287_p8 = scmp.lt.s32.totalorder (!%p225_p3), %s1026_s15, 3  ;;  %p849_p9 = scmp.ne.s32.totalorder (!%p225_p3), %s1026_s15, 0 }
   0xd   : > { %s1216_s24 = smov (%p35_p5, %s1214_s24), 0 }
   0xe   : > { %1199 = sst [smem:[#allocation6_spill]] %s1216_s24 }
  0x10   : > { %s1218_s16 = smov (!%p276_p6, %s1030_s16), 1  ;;  %s1220_s17 = smov (!%p278_p7, %s1034_s17), 3 }
  0x11   : > { %s838_s25 = sshll.u32 %s1218_s16, 3  ;;  %s840_s26 = sshll.u32 %s1218_s16, 2 }
  0x12   : > { %s837_s27 = sshll.u32 %s1220_s17, 1  ;;  %s868_s28 = sshll.u32 %s1220_s17, 4 }
  0x13   : > { %s282_s29 = sadd.s32 %s838_s25, %s837_s27  ;;  %s297_s6 = scalar_lea.vmem %s1196_s2, %s868_s28 }
  0x14   : > { %s839_s7 = sshll.u32 %s282_s29, 2  ;;  %s1137_s10 = scalar_lea.vmem %s1197_s3, %s868_s28 }
  0x15   : > { %s284_s13 = scalar_lea.vmem %s1194_s0, %s839_s7  ;;  %s1145_s16 = scalar_lea.vmem %s1198_s4, %s839_s7 }
  0x16   : > { %s288_s17 = scalar_select %p287_p8, %s1026_s15, 3 }
  0x17   : > { %316 = sbr.rel (%p849_p9) target bundleno = 240 (0xf0), region = 40 }
  0x18   : > { %s290_s25 = sadd.s32 %s840_s26, %s288_s17 }
  0x19   : > { %s841_s27 = sshll.u32 %s290_s25, 2 }
  0x1a   : > { %s1151_s29 = scalar_lea.vmem %s1195_s1, %s841_s27 }
  0x1c   : > { %vm398_vm0 = vcmask 7168   ;;  %v975_v0 = vld [vmem:[%s297_s6 + $0x8] sm:$0xff]   ;;  %v1052_v1 = vmov 0.0   ;;  %v1053_v2 = vmov -inf   ;;  %v976_v3 = vld [vmem:[%s297_s6] sm:$0xff]   ;;  %vm1054_vm1 = vmmov 0  }
  0x1d   : > { %882 = vmatprep.subr.bf16.mxu0 %v1052_v1  ;;  %399 = vst.msk [vmem:[#allocation3] sm:$0xff] %vm398_vm0, %v1053_v2  ;;  %400 = vst.msk [vmem:[#allocation3 + $0x8] sm:$0xff] %vm398_vm0, %v1053_v2  ;;  %886 = vmatprep.mubr.msk.bf16.mxu0 %vm1054_vm1, %v1052_v1  ;;  %vm340_vm2 = vcmask 261120   ;;  %v977_v4 = vld [vmem:[%s284_s13] sm:$0xff]   ;;  %vm395_vm3 = vcmask 388096  }
  0x1e   : > { %401 = vst.msk [vmem:[#allocation4] sm:$0xff] %vm398_vm0, %v1052_v1  ;;  %402 = vst.msk [vmem:[#allocation4 + $0x8] sm:$0xff] %vm398_vm0, %v1052_v1  ;;  %883 = vmatpush3.bf16.msra.mxu0 %v975_v0 }
  0x1f   : > { %884 = vmatprep.subr.bf16.mxu0 %v1052_v1  ;;  %403 = vst.msk [vmem:[#allocation5] sm:$0xff] %vm340_vm2, %v1052_v1  ;;  %404 = vst.msk [vmem:[#allocation5 + $0x8] sm:$0xff] %vm340_vm2, %v1052_v1 }
  0x22   : > { %885 = vmatpush3.bf16.msra.mxu0 %v976_v3 }
  0x25   : > { %887 = vmatmul.mubr.msk.bf16.vlgmr.msra.gmra.mxu0 %vm340_vm2, %v977_v4 }
  0xe5   : > { %v378_v5 = vpop.f32.mrf.mxu0 }
  0xe7   : > { %v888_v6 = vpop.f32.mrf.mxu0 }
  0xe9   : > { %v381_v7 = vpop.f32.mrf.mxu0 }
  0xea   : > { %v385_v8 = vpack.c.bf16 %v381_v7, %v378_v5 }
  0xeb   : > { %v889_v9 = vpop.f32.mrf.mxu0 }
  0xec   : > { %v387_v10 = vsel %vm340_vm2, %v385_v8, %v977_v4 }
  0xed   : > { %v854_v11 = vcombine.low %v387_v10, %v387_v10  ;;  %v855_v12 = vcombine.high %v387_v10, %v387_v10 }
  0xef   : > { %396 = vst.msk [vmem:[#allocation2] sm:$0xf] %vm395_vm3, %v854_v11  ;;  %397 = vst.msk [vmem:[#allocation2 + $0x4] sm:$0xf] %vm395_vm3, %v855_v12 }
  0xf0 PF: > { %v405_v13 = vld [vmem:[%s1151_s29] sm:$0xf]  ;;  %vm413_vm4 = vcmask 392192   ;;  %v1055_v14 = vmov 0.0   ;;  %vm1056_vm5 = vmmov 0   ;;  %v463_v17 = vlaneseq  ;;  %s858_s24 = sshll.u32 %s1026_s15, 3 }
  0xf1   : > { %890 = vmatprep.subr.bf16.mxu0 %v1055_v14  ;;  %v418_v15 = vsel %vm413_vm4, %v405_v13, 0  ;;  %892 = vmatprep.mubr.msk.bf16.mxu0 %vm1056_vm5, %v1055_v14  ;;  %v469_v19 = vstv %s858_s24  ;;  %vm480_vm9 = vcmask 64512   ;;  %v1057_v33 = vmov 0   ;;  %v478_v34 = vld [vmem:[#allocation3] sm:$0xff]  ;;  %v479_v37 = vld [vmem:[#allocation3 + $0x8] sm:$0xff]  ;;  %v511_v58 = vld [vmem:[#allocation4] sm:$0xff] }
  0xf2   : > { %891 = vmatpush3.bf16.xpose.msra.mxu0 %v418_v15  ;;  %896 = vmatprep.subr.bf16.mxu1 %v1055_v14  ;;  %v468_v18 = vand.u32 127, %v463_v17  ;;  %v464_v20 = vshrl.u32 %v463_v17, 7  ;;  %vm523_vm12 = vcmask 7168   ;;  %vm544_vm13 = vcmask 1043456   ;;  %v512_v61 = vld [vmem:[#allocation4 + $0x8] sm:$0xff]  ;;  %v526_v2 = vld [vmem:[#allocation5] sm:$0xff] }
  0xf3   : > { %898 = vmatprep.mubr.msk.bf16.mxu1 %vm1056_vm5, %v1055_v14  ;;  %978 = vset.pattern.permute.xlu1 %v1057_v33  ;;  %v545_v42 = vsel %vm544_vm13, %v405_v13, 0  ;;  %v527_v5 = vld [vmem:[#allocation5 + $0x8] sm:$0xff]  ;;  %vm590_vm14 = vcmask 261120   ;;  %p860_p10 = scmp.ne.s32.totalorder %s1026_s15, 1 }
  0xf4   : > { %v470_v21 = vadd.s32 %v469_v19, %v468_v18  ;;  %v465_v22 = vadd.s32 8, %v464_v20  ;;  %979 = vset.pattern.permute.xlu0 %v1057_v33  ;;  %897 = vmatpush3.bf16.msra.mxu1 %v545_v42 }
  0xf6   : > { %v980_v16 = vld [vmem:[#allocation2] sm:$0xff]   ;;  %vm471_vm6 = vcmp.le.s32.totalorder %v470_v21, %v464_v20  ;;  %vm473_vm7 = vcmp.lt.s32.totalorder %v470_v21, 16  ;;  %vm472_vm10 = vcmp.le.s32.totalorder %v470_v21, %v465_v22 }
  0xf7   : > { %vm474_vm8 = vmand %vm471_vm6, %vm473_vm7 }
  0xf8   : > { %vm475_vm11 = vmand %vm472_vm10, %vm473_vm7 }
  0xf9   : > { %893 = vmatmul.mubr.msk.bf16.vlgmr.msra.gmra.mxu0 %vm413_vm4, %v980_v16 }
 0x1b9   : > { %v454_v23 = vpop.f32.mrf.mxu0 }
 0x1ba   : > { %v461_v24 = vmul.f32 0.14433756, %v454_v23 }
 0x1bb   : > { %v894_v25 = vpop.f32.mrf.mxu0 }
 0x1bc   : > { %v476_v26 = vsel %vm474_vm8, %v461_v24, -1e+30 }
 0x1bd   : > { %v457_v27 = vpop.f32.mrf.mxu0  ;;  %v481_v28 = vsel %vm480_vm9, %v476_v26, -inf }
 0x1be   : > { %v462_v29 = vmul.f32 0.14433756, %v457_v27  ;;  %482 = vmax.xlane.f32.xlu0 %v481_v28 }
 0x1bf   : > { %v895_v30 = vpop.f32.mrf.mxu0 }
 0x1c0   : > { %v477_v31 = vsel %vm475_vm11, %v462_v29, -1e+30 }
 0x1c1   : > { %v484_v32 = vsel %vm480_vm9, %v477_v31, -inf }
 0x1c2   : > { %485 = vmax.xlane.f32.xlu0 %v484_v32 }
 0x247   : > { %v483_v35 = vpop.xlane.xlu0 %482 }
 0x248   : > { %v487_v36 = vmax.f32 %v478_v34, %v483_v35 }
 0x24a   : > { %v489_v38 = vsub.f32 %v478_v34, %v487_v36  ;;  %593 = vst.msk [vmem:[#allocation3] sm:$0xff] %vm523_vm12, %v487_v36  ;;  %497 = vperm.xlu1 %978, %v487_v36  }
 0x24b   : > { %v486_v39 = vpop.xlane.xlu0 %485 }
 0x24c   : > { %v488_v40 = vmax.f32 %v479_v37, %v486_v39  ;;  %v491_v55 = vmul.f32 1.442695, %v489_v38 }
 0x24e   : > { %v490_v41 = vsub.f32 %v479_v37, %v488_v40  ;;  %594 = vst.msk [vmem:[#allocation3 + $0x8] sm:$0xff] %vm523_vm12, %v488_v40  ;;  %502 = vperm.xlu1 %978, %v488_v40  }
 0x250   : > { %v493_v52 = vmul.f32 1.442695, %v490_v41 }
 0x2c5   : > { %v498_v43 = vpop.permute.xlu1 %497 }
 0x2c6   : > { %v505_v44 = vsub.f32 %v476_v26, %v498_v43 }
 0x2c8   : > { %v507_v45 = vmul.f32 1.442695, %v505_v44 }
 0x2c9   : > { %v503_v46 = vpop.permute.xlu1 %502 }
 0x2ca   : > { %981 = vpow2.f32 %v507_v45  ;;  %v506_v47 = vsub.f32 %v477_v31, %v503_v46 }
 0x2cc   : > { %v509_v48 = vmul.f32 1.442695, %v506_v47 }
 0x2ce   : > { %983 = vpow2.f32 %v509_v48 }
 0x2cf   : > { %985 = vpow2.f32 %v493_v52 }
 0x2d0   : > { %987 = vpow2.f32 %v491_v55 }
 0x2d7   : > { %v982_v49 = vpop.eup %981 }
 0x2d8   : > { %v515_v50 = vsel %vm480_vm9, %v982_v49, 0.0 }
 0x2d9   : > { %516 = vadd.xlane.f32.xlu0 %v515_v50 }
 0x2db   : > { %v984_v51 = vpop.eup %983 }
 0x2dc   : > { %v518_v53 = vsel %vm480_vm9, %v984_v51, 0.0  ;;  %v540_v54 = vpack.c.bf16 %v984_v51, %v982_v49  ;;  %v986_v56 = vpop.eup %985 }
 0x2dd   : > { %519 = vadd.xlane.f32.xlu1 %v518_v53  ;;  %v988_v57 = vpop.eup %987  ;;  %v514_v63 = vmul.f32 %v986_v56, %v512_v61 }
 0x2de   : > { %899 = vmatmul.mubr.msk.bf16.vlgmr.msra.gmra.mxu1 %vm480_vm9, %v540_v54  ;;  %v513_v59 = vmul.f32 %v988_v57, %v511_v58 }
 0x2ee   : > { %535 = vperm.xlu1 %978, %v986_v56  }
 0x2ef   : > { %530 = vperm.xlu0 %979, %v988_v57  }
 0x362   : > { %v517_v60 = vpop.xlane.xlu0 %516 }
 0x363   : > { %v521_v62 = vadd.f32 %v517_v60, %v513_v59 }
 0x365   : > { %524 = vst.msk [vmem:[#allocation4] sm:$0xff] %vm523_vm12, %v521_v62 }
 0x366   : > { %v520_v0 = vpop.xlane.xlu1 %519 }
 0x367   : > { %v522_v1 = vadd.f32 %v520_v0, %v514_v63 }
 0x369   : > { %525 = vst.msk [vmem:[#allocation4 + $0x8] sm:$0xff] %vm523_vm12, %v522_v1 }
 0x36a   : > { %v531_v3 = vpop.permute.xlu0 %530  ;;  %v536_v6 = vpop.permute.xlu1 %535 }
 0x36b   : > { %v538_v4 = vmul.f32 %v531_v3, %v526_v2  ;;  %v539_v10 = vmul.f32 %v536_v6, %v527_v5 }
 0x39e   : > { %v581_v7 = vpop.f32.mrf.mxu1 }
 0x39f   : > { %v588_v8 = vadd.f32 %v581_v7, %v538_v4 }
 0x3a0   : > { %v900_v9 = vpop.f32.mrf.mxu1 }
 0x3a1   : > { %591 = vst.msk [vmem:[#allocation5] sm:$0xff] %vm590_vm14, %v588_v8  ;;  %598 = sbr.rel (%p860_p10) target bundleno = 1281 (0x501), region = 44 }
 0x3a2   : > { %v584_v11 = vpop.f32.mrf.mxu1 }
 0x3a3   : > { %v589_v12 = vadd.f32 %v584_v11, %v539_v10 }
 0x3a4   : > { %v901_v13 = vpop.f32.mrf.mxu1 }
 0x3a5   : > { %592 = vst.msk [vmem:[#allocation5 + $0x8] sm:$0xff] %vm590_vm14, %v589_v12 }
 0x3a6   : > { %v601_v14 = vld [vmem:[#allocation4] sm:$0xff]  ;;  %v602_v15 = vld [vmem:[#allocation4 + $0x8] sm:$0xff]  ;;  %v1058_v16 = vmov 0   ;;  %v990_v17 = vld [vmem:[%s1137_s10 + $0x8] sm:$0xff]   ;;  %v1059_v18 = vmov 0.0   ;;  %vm1060_vm15 = vmmov 0  }
 0x3a7   : > { %989 = vset.pattern.permute.xlu0 %v1058_v16  ;;  %992 = vrcp.f32 %v601_v14  ;;  %902 = vmatprep.subr.bf16.mxu0 %v1059_v18  ;;  %v991_v20 = vld [vmem:[%s1137_s10] sm:$0xff]   ;;  %vm686_vm0 = vcmask 257024  }
 0x3a8   : > { %994 = vrcp.f32 %v602_v15  ;;  %903 = vmatpush3.bf16.msra.mxu0 %v990_v17  ;;  %906 = vmatprep.mubr.msk.bf16.mxu0 %vm1060_vm15, %v1059_v18  ;;  %v599_v23 = vld [vmem:[#allocation5] sm:$0xff] }
 0x3a9   : > { %904 = vmatprep.subr.bf16.mxu0 %v1059_v18 }
 0x3ac   : > { %905 = vmatpush3.bf16.msra.mxu0 %v991_v20  ;;  %v600_v24 = vld [vmem:[#allocation5 + $0x8] sm:$0xff] }
 0x3b4   : > { %v993_v19 = vpop.eup %992 }
 0x3b5   : > { %607 = vperm.xlu0 %989, %v993_v19   ;;  %v995_v21 = vpop.eup %994 }
 0x3b9   : > { %612 = vperm.xlu0 %989, %v995_v21  }
 0x430   : > { %v608_v22 = vpop.permute.xlu0 %607 }
 0x431   : > { %v615_v26 = vmul.f32 %v608_v22, %v599_v23 }
 0x434   : > { %v613_v25 = vpop.permute.xlu0 %612 }
 0x435   : > { %v616_v27 = vmul.f32 %v613_v25, %v600_v24 }
 0x437   : > { %v621_v28 = vpack.c.bf16 %v616_v27, %v615_v26 }
 0x439   : > { %907 = vmatmul.mubr.msk.bf16.vlgmr.msra.gmra.mxu0 %vm590_vm14, %v621_v28 }
 0x4f9   : > { %v671_v29 = vpop.f32.mrf.mxu0 }
 0x4fa   : > { %v870_v30 = vpack.c.bf16 %v671_v29, %v671_v29 }
 0x4fb   : > { %v908_v31 = vpop.f32.mrf.mxu0 }
 0x4fc   : > { %687 = vst.msk [vmem:[%s1145_s16] sm:$0xf] %vm686_vm0, %v870_v30 }
 0x4fd   : > { %v674_v32 = vpop.f32.mrf.mxu0 }
 0x4fe   : > { %v871_v33 = vpack.c.bf16 %v674_v32, %v674_v32 }
 0x4ff   : > { %v909_v34 = vpop.f32.mrf.mxu0 }
 0x500   : > { %688 = vst.msk [vmem:[%s1145_s16 + $0x4] sm:$0xf] %vm686_vm0, %v871_v33 }
 0x501 PF: > { %s14_s21 = sadd.s32 1, %s1050_s21   ;;  %s1200_s26 = sld [smem:[#allocation6_spill]] }
 0x502   : > { %p11_p11 = scmp.ge.s32.totalorder %s14_s21, 18   ;;  %s1201_s15 = smov %s1038_s18 }
 0x503   : > { %s1202_s16 = smov %s1042_s19  ;;  %s1203_s17 = smov %s1046_s20 }
 0x504   : > { %s1204_s18 = smov %s1208_s22  ;;  %s1205_s19 = smov %s1212_s23 }
 0x505   :  { %13 = sbr.rel (!%p11_p11) target bundleno = 4 (0x4), region = 83 }
 0x507   : > { %s1206_s20 = smov %s1200_s26 }

</bundles_post_ra>
